<compile_context>
chip_gen: v7x
topology: tpu7x:2x2x1
jax: 0.10.0
libtpu: 0.0.40
codegen_flags: <defaults>
</compile_context>

<pallas_src>
import jax
import jax.numpy as jnp
from jax.experimental import pallas as pl
from jax.experimental.pallas import tpu as pltpu


def _round_up(x, m):
    return ((x + m - 1) // m) * m


def head_kernel(r_ref, l_ref,
                w1_rr_ref, w1_lr_ref, w1_rl_ref, w1_ll_ref,
                b1_r_ref, b1_l_ref,
                w2_r_ref, w2_l_ref, b2_ref,
                out_ref):
    BB, T, in_ch = r_ref.shape

    r = r_ref[...]                                     # (BB, T, in_ch)
    l = l_ref[...]                                     # (BB, T, in_ch)

    # Flatten batch*time into one big M dim for the MXU (T=8 keeps this a pure
    # re-tiling; a non multiple-of-8 T would cost a relayout copy).
    rf = r.reshape(BB * T, in_ch)
    lf = l.reshape(BB * T, in_ch)

    # temporal_merging Linear(C, C) with W1 split into quadrants so neither the
    # concat(r, l) nor any lane slice at offset in_ch is ever materialized:
    #   y[:, :, :in_ch]  = r @ W1[:in_ch, :in_ch] + l @ W1[in_ch:, :in_ch] + b1[:in_ch]
    #   y[:, :, in_ch:]  = r @ W1[:in_ch, in_ch:] + l @ W1[in_ch:, in_ch:] + b1[in_ch:]
    y_r = (jnp.dot(rf, w1_rr_ref[...], preferred_element_type=jnp.float32)
           + jnp.dot(lf, w1_lr_ref[...], preferred_element_type=jnp.float32)
           + b1_r_ref[...]).reshape(BB, T, in_ch)
    y_l = (jnp.dot(rf, w1_rl_ref[...], preferred_element_type=jnp.float32)
           + jnp.dot(lf, w1_ll_ref[...], preferred_element_type=jnp.float32)
           + b1_l_ref[...]).reshape(BB, T, in_ch)

    # Softmax over the time axis (axis=1), per channel column.  The divide by
    # the denominator is factored out of the time-max below: 1/denom > 0 and is
    # constant over T, so  max_T(e*x/denom) == (1/denom) * max_T(e*x).
    e_r = jnp.exp(y_r - jnp.max(y_r, axis=1, keepdims=True))
    e_l = jnp.exp(y_l - jnp.max(y_l, axis=1, keepdims=True))
    inv_r = pl.reciprocal(jnp.sum(e_r, axis=1), approx=False)   # (BB, in_ch)
    inv_l = pl.reciprocal(jnp.sum(e_l, axis=1), approx=False)   # exact: keeps 1e-5 accuracy

    # Gate the (still un-concatenated) inputs, max-pool over time, then rescale.
    m_r = inv_r * jnp.max(e_r * r, axis=1)             # (BB, in_ch)
    m_l = inv_l * jnp.max(e_l * l, axis=1)             # (BB, in_ch)

    # Classifier Linear(C, NC):  m @ W2 = m_r @ W2[:in_ch] + m_l @ W2[in_ch:]
    out = (jnp.dot(m_r, w2_r_ref[...], preferred_element_type=jnp.float32)
           + jnp.dot(m_l, w2_l_ref[...], preferred_element_type=jnp.float32)
           + b2_ref[...])                              # (BB, NC_pad)
    out_ref[...] = out.astype(out_ref.dtype)


def _choose_block_b(B, T, in_ch, C, NC_pad, *, target_steps=4, max_block_b=512,
                    vmem_budget_bytes=20 << 20):
    """Pick the batch block BB, grid step count, and an explicit VMEM limit."""
    lane, sub = 128, 8
    in_ch_p = _round_up(in_ch, lane)
    c_p = _round_up(C, lane)
    in_ch_s = _round_up(in_ch, sub)

    # Per-batch-row VMEM (bytes): 2 inputs x 2 pipeline buffers of (T, in_ch_p)
    # f32, plus ~3 live (T, ~C_p)-sized f32 intermediates (y/e/gated).
    per_row = (2 * 2 * T * in_ch_p + 3 * T * c_p) * 4
    # Weights/biases; conservatively assume double-buffering (Buffered(1) halves it).
    weight_bytes = 2 * 4 * (4 * in_ch_s * in_ch_p + 2 * sub * in_ch_p
                            + 2 * in_ch_s * NC_pad + sub * NC_pad)

    if B <= 8:
        # Tiny batch: a single full-extent block (block sublane dim == B is legal).
        bb = B
    else:
        avail = max(vmem_budget_bytes - weight_bytes, 8 * per_row)
        bb_vmem = max(8, (avail // per_row) // 8 * 8)            # VMEM-budget cap
        bb_split = max(8, _round_up(pl.cdiv(B, target_steps), 8))  # >= target_steps steps
        bb = int(min(max_block_b, bb_vmem, bb_split))

    steps = pl.cdiv(B, bb)
    # Explicit scoped-VMEM limit: covers the working set with margin, raises
    # v5e's 16 MiB default, and stays within v7x's 64 MiB physical VMEM.
    est = weight_bytes + per_row * bb + (2 << 20)
    vmem_limit = int(min(64 << 20, max(32 << 20, est)))
    return bb, steps, vmem_limit


def _weight_spec(shape, pipeline_mode):
    idx = lambda b: (0,) * len(shape)
    if pipeline_mode is None:
        return pl.BlockSpec(shape, idx)
    return pl.BlockSpec(shape, idx, pipeline_mode=pipeline_mode)


def head_forward(rhand, lhand, w1, b1, w2, b2, *, target_steps=4, max_block_b=512):
    """rhand, lhand: (B, T, in_channels). Returns (B, num_classes)."""
    B, T, in_ch = rhand.shape
    C = 2 * in_ch
    NC = w2.shape[1]
    NC_pad = _round_up(NC, 128)

    w1 = jnp.asarray(w1, jnp.float32)
    b1 = jnp.asarray(b1, jnp.float32).reshape(1, C)
    b2 = jnp.asarray(b2, jnp.float32).reshape(1, NC)

    # Pad only the (tiny) classifier weights/bias to a 128-multiple output dim
    # for lane-dense stores; extra columns are zero and sliced off at the end.
    w2p = jnp.pad(jnp.asarray(w2, jnp.float32), ((0, 0), (0, NC_pad - NC)))
    b2p = jnp.pad(b2, ((0, 0), (0, NC_pad - NC)))

    # Split the weights by input rows AND output columns so the kernel never
    # forms concat(r, l) and never slices the lane axis at a non-128 offset.
    w1_rr, w1_lr = w1[:in_ch, :in_ch], w1[in_ch:, :in_ch]
    w1_rl, w1_ll = w1[:in_ch, in_ch:], w1[in_ch:, in_ch:]
    b1_r, b1_l = b1[:, :in_ch], b1[:, in_ch:]
    w2_r, w2_l = w2p[:in_ch], w2p[in_ch:]

    BB, grid_steps, vmem_limit = _choose_block_b(
        B, T, in_ch, C, NC_pad, target_steps=target_steps, max_block_b=max_block_b)

    cost = pl.CostEstimate(
        flops=int(2 * B * T * C * C + 2 * B * C * NC_pad),
        transcendentals=int(B * T * C),
        bytes_accessed=int(4 * (2 * B * T * in_ch + B * NC_pad
                                + C * C + C + C * NC_pad + NC_pad)),
    )

    def run(weights_pipeline_mode):
        in_specs = [
            pl.BlockSpec((BB, T, in_ch), lambda b: (b, 0, 0)),   # rhand rows (double-buffered)
            pl.BlockSpec((BB, T, in_ch), lambda b: (b, 0, 0)),   # lhand rows (double-buffered)
            _weight_spec((in_ch, in_ch), weights_pipeline_mode),    # W1[:in_ch, :in_ch]
            _weight_spec((in_ch, in_ch), weights_pipeline_mode),    # W1[in_ch:, :in_ch]
            _weight_spec((in_ch, in_ch), weights_pipeline_mode),    # W1[:in_ch, in_ch:]
            _weight_spec((in_ch, in_ch), weights_pipeline_mode),    # W1[in_ch:, in_ch:]
            _weight_spec((1, in_ch), weights_pipeline_mode),         # b1[:in_ch]
            _weight_spec((1, in_ch), weights_pipeline_mode),         # b1[in_ch:]
            _weight_spec((in_ch, NC_pad), weights_pipeline_mode),    # W2[:in_ch]
            _weight_spec((in_ch, NC_pad), weights_pipeline_mode),    # W2[in_ch:]
            _weight_spec((1, NC_pad), weights_pipeline_mode),        # b2
        ]
        return pl.pallas_call(
            head_kernel,
            out_shape=jax.ShapeDtypeStruct((B, NC_pad), jnp.float32),
            grid_spec=pltpu.PrefetchScalarGridSpec(
                num_scalar_prefetch=0,
                grid=(grid_steps,),          # >= 4 steps for large B; ragged tail handled by Pallas
                in_specs=in_specs,
                out_specs=pl.BlockSpec((BB, NC_pad), lambda b: (b, 0)),
            ),
            compiler_params=pltpu.CompilerParams(
                dimension_semantics=("parallel",),   # shards batch steps across v7x TensorCores
                vmem_limit_bytes=vmem_limit,
            ),
            cost_estimate=cost,
        )(rhand, lhand, w1_rr, w1_lr, w1_rl, w1_ll, b1_r, b1_l, w2_r, w2_l, b2p)

    try:
        # Invariant weights only need a single pipeline buffer.
        out = run(pl.Buffered(1))
    except Exception:
        # Fallback if this JAX build does not accept pipeline_mode here.
        out = run(None)

    return out[:, :NC]


def head_reference(rhand, lhand, w1, b1, w2, b2):
    """Pure-JAX reference mirroring the PyTorch forward."""
    x = jnp.concatenate((rhand, lhand), axis=2)                    # (B, T, C)
    y = x @ w1 + b1.reshape(1, 1, -1)                              # (B, T, C)
    s = jax.nn.softmax(y, axis=1)                                  # softmax over T
    z = s * x
    m = jnp.max(z, axis=1)                                         # (B, C)
    return m @ w2 + b2.reshape(1, -1)                              # (B, NC)


if __name__ == "__main__":
    # Small shapes consistent with the module.
    B, T, in_channels, num_classes = 2, 8, 16, 16
    C = in_channels * 2

    key = jax.random.PRNGKey(0)
    k_r, k_l, k_w1, k_b1, k_w2, k_b2 = jax.random.split(key, 6)

    rhand = jax.random.normal(k_r, (B, T, in_channels), dtype=jnp.float32)
    lhand = jax.random.normal(k_l, (B, T, in_channels), dtype=jnp.float32)

    # Deterministic parameter init (PyTorch-Linear-style uniform bounds).
    bound1 = 1.0 / (C ** 0.5)
    w1 = jax.random.uniform(k_w1, (C, C), jnp.float32, -bound1, bound1)
    b1 = jax.random.uniform(k_b1, (C,), jnp.float32, -bound1, bound1)
    w2 = jax.random.uniform(k_w2, (C, num_classes), jnp.float32, -bound1, bound1)
    b2 = jax.random.uniform(k_b2, (num_classes,), jnp.float32, -bound1, bound1)

    out = head_forward(rhand, lhand, w1, b1, w2, b2)
    out = jax.block_until_ready(out)

    ref = head_reference(rhand, lhand, w1, b1, w2, b2)
    assert out.shape == (B, num_classes)
    assert jnp.allclose(out, ref, atol=1e-4, rtol=1e-4), "mismatch vs reference"

    print("KERNEL_OK")
</pallas_src>

<mosaic_0001>
module attributes {stable_mosaic.version = 11 : i64} {
  func.func @head_kernel(%arg0: i32, %arg1: memref<2x8x16xf32, #tpu.memory_space<vmem>>, %arg2: memref<2x8x16xf32, #tpu.memory_space<vmem>>, %arg3: memref<16x16xf32, #tpu.memory_space<vmem>>, %arg4: memref<16x16xf32, #tpu.memory_space<vmem>>, %arg5: memref<16x16xf32, #tpu.memory_space<vmem>>, %arg6: memref<16x16xf32, #tpu.memory_space<vmem>>, %arg7: memref<1x16xf32, #tpu.memory_space<vmem>>, %arg8: memref<1x16xf32, #tpu.memory_space<vmem>>, %arg9: memref<16x128xf32, #tpu.memory_space<vmem>>, %arg10: memref<16x128xf32, #tpu.memory_space<vmem>>, %arg11: memref<1x128xf32, #tpu.memory_space<vmem>>, %arg12: memref<2x128xf32, #tpu.memory_space<vmem>>) attributes {dimension_semantics = [#tpu.dimension_semantics<parallel>], iteration_bounds = array<i64: 1>, scalar_prefetch = 0 : i64, scratch_operands = 0 : i64, tpu.core_type = #tpu.core_type<tc>, window_params = [{transform_indices = @transform_0, window_bounds = array<i64: 2, 8, 16>}, {transform_indices = @transform_1, window_bounds = array<i64: 2, 8, 16>}, {pipeline_mode = #tpu.pipeline_mode<synchronous>, transform_indices = @transform_2, window_bounds = array<i64: 16, 16>}, {pipeline_mode = #tpu.pipeline_mode<synchronous>, transform_indices = @transform_3, window_bounds = array<i64: 16, 16>}, {pipeline_mode = #tpu.pipeline_mode<synchronous>, transform_indices = @transform_4, window_bounds = array<i64: 16, 16>}, {pipeline_mode = #tpu.pipeline_mode<synchronous>, transform_indices = @transform_5, window_bounds = array<i64: 16, 16>}, {pipeline_mode = #tpu.pipeline_mode<synchronous>, transform_indices = @transform_6, window_bounds = array<i64: 1, 16>}, {pipeline_mode = #tpu.pipeline_mode<synchronous>, transform_indices = @transform_7, window_bounds = array<i64: 1, 16>}, {pipeline_mode = #tpu.pipeline_mode<synchronous>, transform_indices = @transform_8, window_bounds = array<i64: 16, 128>}, {pipeline_mode = #tpu.pipeline_mode<synchronous>, transform_indices = @transform_9, window_bounds = array<i64: 16, 128>}, {pipeline_mode = #tpu.pipeline_mode<synchronous>, transform_indices = @transform_10, window_bounds = array<i64: 1, 128>}, {transform_indices = @transform_11, window_bounds = array<i64: 2, 128>}]} {
    %c0 = arith.constant 0 : index
    %c0_0 = arith.constant 0 : index
    %c0_1 = arith.constant 0 : index
    %0 = vector.load %arg1[%c0, %c0_0, %c0_1] : memref<2x8x16xf32, #tpu.memory_space<vmem>>, vector<2x8x16xf32>
    %c0_2 = arith.constant 0 : index
    %c0_3 = arith.constant 0 : index
    %c0_4 = arith.constant 0 : index
    %1 = vector.load %arg2[%c0_2, %c0_3, %c0_4] : memref<2x8x16xf32, #tpu.memory_space<vmem>>, vector<2x8x16xf32>
    %2 = vector.shape_cast %0 : vector<2x8x16xf32> to vector<16x16xf32>
    %3 = vector.shape_cast %1 : vector<2x8x16xf32> to vector<16x16xf32>
    %c0_5 = arith.constant 0 : index
    %c0_6 = arith.constant 0 : index
    %4 = vector.load %arg3[%c0_5, %c0_6] : memref<16x16xf32, #tpu.memory_space<vmem>>, vector<16x16xf32>
    %cst = arith.constant dense<0.000000e+00> : vector<16x16xf32>
    %5 = tpu.matmul %2, %4, %cst {dimension_numbers = #tpu.dot_dimension_numbers<[1], [0], [0], [1], [0, 0, 1, 1], [], []>} : vector<16x16xf32>, vector<16x16xf32>, vector<16x16xf32> -> vector<16x16xf32>
    %c0_7 = arith.constant 0 : index
    %c0_8 = arith.constant 0 : index
    %6 = vector.load %arg4[%c0_7, %c0_8] : memref<16x16xf32, #tpu.memory_space<vmem>>, vector<16x16xf32>
    %cst_9 = arith.constant dense<0.000000e+00> : vector<16x16xf32>
    %7 = tpu.matmul %3, %6, %cst_9 {dimension_numbers = #tpu.dot_dimension_numbers<[1], [0], [0], [1], [0, 0, 1, 1], [], []>} : vector<16x16xf32>, vector<16x16xf32>, vector<16x16xf32> -> vector<16x16xf32>
    %8 = arith.addf %5, %7 : vector<16x16xf32>
    %c0_10 = arith.constant 0 : index
    %c0_11 = arith.constant 0 : index
    %9 = vector.load %arg7[%c0_10, %c0_11] : memref<1x16xf32, #tpu.memory_space<vmem>>, vector<1x16xf32>
    %10 = vector.broadcast %9 : vector<1x16xf32> to vector<16x16xf32>
    %11 = arith.addf %8, %10 : vector<16x16xf32>
    %12 = vector.shape_cast %11 : vector<16x16xf32> to vector<2x8x16xf32>
    %c0_12 = arith.constant 0 : index
    %c0_13 = arith.constant 0 : index
    %13 = vector.load %arg5[%c0_12, %c0_13] : memref<16x16xf32, #tpu.memory_space<vmem>>, vector<16x16xf32>
    %cst_14 = arith.constant dense<0.000000e+00> : vector<16x16xf32>
    %14 = tpu.matmul %2, %13, %cst_14 {dimension_numbers = #tpu.dot_dimension_numbers<[1], [0], [0], [1], [0, 0, 1, 1], [], []>} : vector<16x16xf32>, vector<16x16xf32>, vector<16x16xf32> -> vector<16x16xf32>
    %c0_15 = arith.constant 0 : index
    %c0_16 = arith.constant 0 : index
    %15 = vector.load %arg6[%c0_15, %c0_16] : memref<16x16xf32, #tpu.memory_space<vmem>>, vector<16x16xf32>
    %cst_17 = arith.constant dense<0.000000e+00> : vector<16x16xf32>
    %16 = tpu.matmul %3, %15, %cst_17 {dimension_numbers = #tpu.dot_dimension_numbers<[1], [0], [0], [1], [0, 0, 1, 1], [], []>} : vector<16x16xf32>, vector<16x16xf32>, vector<16x16xf32> -> vector<16x16xf32>
    %17 = arith.addf %14, %16 : vector<16x16xf32>
    %c0_18 = arith.constant 0 : index
    %c0_19 = arith.constant 0 : index
    %18 = vector.load %arg8[%c0_18, %c0_19] : memref<1x16xf32, #tpu.memory_space<vmem>>, vector<1x16xf32>
    %19 = vector.broadcast %18 : vector<1x16xf32> to vector<16x16xf32>
    %20 = arith.addf %17, %19 : vector<16x16xf32>
    %21 = vector.shape_cast %20 : vector<16x16xf32> to vector<2x8x16xf32>
    %cst_20 = arith.constant dense<0xFF800000> : vector<2x16xf32>
    %22 = vector.multi_reduction <maximumf>, %12, %cst_20 [1] : vector<2x8x16xf32> to vector<2x16xf32>
    %23 = vector.shape_cast %22 : vector<2x16xf32> to vector<2x1x16xf32>
    %24 = vector.broadcast %23 : vector<2x1x16xf32> to vector<2x8x16xf32>
    %25 = arith.subf %12, %24 : vector<2x8x16xf32>
    %26 = math.exp %25 : vector<2x8x16xf32>
    %cst_21 = arith.constant dense<0xFF800000> : vector<2x16xf32>
    %27 = vector.multi_reduction <maximumf>, %21, %cst_21 [1] : vector<2x8x16xf32> to vector<2x16xf32>
    %28 = vector.shape_cast %27 : vector<2x16xf32> to vector<2x1x16xf32>
    %29 = vector.broadcast %28 : vector<2x1x16xf32> to vector<2x8x16xf32>
    %30 = arith.subf %21, %29 : vector<2x8x16xf32>
    %31 = math.exp %30 : vector<2x8x16xf32>
    %cst_22 = arith.constant dense<0.000000e+00> : vector<2x16xf32>
    %32 = vector.multi_reduction <add>, %26, %cst_22 [1] : vector<2x8x16xf32> to vector<2x16xf32>
    %33 = tpu.reciprocal %32 : vector<2x16xf32> -> vector<2x16xf32>
    %cst_23 = arith.constant dense<0.000000e+00> : vector<2x16xf32>
    %34 = vector.multi_reduction <add>, %31, %cst_23 [1] : vector<2x8x16xf32> to vector<2x16xf32>
    %35 = tpu.reciprocal %34 : vector<2x16xf32> -> vector<2x16xf32>
    %36 = arith.mulf %26, %0 : vector<2x8x16xf32>
    %cst_24 = arith.constant dense<0xFF800000> : vector<2x16xf32>
    %37 = vector.multi_reduction <maximumf>, %36, %cst_24 [1] : vector<2x8x16xf32> to vector<2x16xf32>
    %38 = arith.mulf %33, %37 : vector<2x16xf32>
    %39 = arith.mulf %31, %1 : vector<2x8x16xf32>
    %cst_25 = arith.constant dense<0xFF800000> : vector<2x16xf32>
    %40 = vector.multi_reduction <maximumf>, %39, %cst_25 [1] : vector<2x8x16xf32> to vector<2x16xf32>
    %41 = arith.mulf %35, %40 : vector<2x16xf32>
    %c0_26 = arith.constant 0 : index
    %c0_27 = arith.constant 0 : index
    %42 = vector.load %arg9[%c0_26, %c0_27] : memref<16x128xf32, #tpu.memory_space<vmem>>, vector<16x128xf32>
    %cst_28 = arith.constant dense<0.000000e+00> : vector<2x128xf32>
    %43 = tpu.matmul %38, %42, %cst_28 {dimension_numbers = #tpu.dot_dimension_numbers<[1], [0], [0], [1], [0, 0, 1, 1], [], []>} : vector<2x16xf32>, vector<16x128xf32>, vector<2x128xf32> -> vector<2x128xf32>
    %c0_29 = arith.constant 0 : index
    %c0_30 = arith.constant 0 : index
    %44 = vector.load %arg10[%c0_29, %c0_30] : memref<16x128xf32, #tpu.memory_space<vmem>>, vector<16x128xf32>
    %cst_31 = arith.constant dense<0.000000e+00> : vector<2x128xf32>
    %45 = tpu.matmul %41, %44, %cst_31 {dimension_numbers = #tpu.dot_dimension_numbers<[1], [0], [0], [1], [0, 0, 1, 1], [], []>} : vector<2x16xf32>, vector<16x128xf32>, vector<2x128xf32> -> vector<2x128xf32>
    %46 = arith.addf %43, %45 : vector<2x128xf32>
    %c0_32 = arith.constant 0 : index
    %c0_33 = arith.constant 0 : index
    %47 = vector.load %arg11[%c0_32, %c0_33] : memref<1x128xf32, #tpu.memory_space<vmem>>, vector<1x128xf32>
    %48 = vector.broadcast %47 : vector<1x128xf32> to vector<2x128xf32>
    %49 = arith.addf %46, %48 : vector<2x128xf32>
    %c0_34 = arith.constant 0 : index
    %c0_35 = arith.constant 0 : index
    %50 = vector.load %arg12[%c0_34, %c0_35] : memref<2x128xf32, #tpu.memory_space<vmem>>, vector<2x128xf32>
    tpu.vector_store %arg12[%c0_34, %c0_35], %49 {strides = array<i32>} : memref<2x128xf32, #tpu.memory_space<vmem>>, vector<2x128xf32>,
    return
  }
  func.func @transform_0(%arg0: i32) -> (i32, i32, i32) {
    %c0_i32 = arith.constant 0 : i32
    %c0_i32_0 = arith.constant 0 : i32
    %c0_i32_1 = arith.constant 0 : i32
    return %arg0, %c0_i32, %c0_i32_0 : i32, i32, i32
  }
  func.func @transform_1(%arg0: i32) -> (i32, i32, i32) {
    %c0_i32 = arith.constant 0 : i32
    %c0_i32_0 = arith.constant 0 : i32
    %c0_i32_1 = arith.constant 0 : i32
    return %arg0, %c0_i32, %c0_i32_0 : i32, i32, i32
  }
  func.func @transform_2(%arg0: i32) -> (i32, i32) {
    %c0_i32 = arith.constant 0 : i32
    %c0_i32_0 = arith.constant 0 : i32
    %c0_i32_1 = arith.constant 0 : i32
    return %c0_i32, %c0_i32_0 : i32, i32
  }
  func.func @transform_3(%arg0: i32) -> (i32, i32) {
    %c0_i32 = arith.constant 0 : i32
    %c0_i32_0 = arith.constant 0 : i32
    %c0_i32_1 = arith.constant 0 : i32
    return %c0_i32, %c0_i32_0 : i32, i32
  }
  func.func @transform_4(%arg0: i32) -> (i32, i32) {
    %c0_i32 = arith.constant 0 : i32
    %c0_i32_0 = arith.constant 0 : i32
    %c0_i32_1 = arith.constant 0 : i32
    return %c0_i32, %c0_i32_0 : i32, i32
  }
  func.func @transform_5(%arg0: i32) -> (i32, i32) {
    %c0_i32 = arith.constant 0 : i32
    %c0_i32_0 = arith.constant 0 : i32
    %c0_i32_1 = arith.constant 0 : i32
    return %c0_i32, %c0_i32_0 : i32, i32
  }
  func.func @transform_6(%arg0: i32) -> (i32, i32) {
    %c0_i32 = arith.constant 0 : i32
    %c0_i32_0 = arith.constant 0 : i32
    %c0_i32_1 = arith.constant 0 : i32
    return %c0_i32, %c0_i32_0 : i32, i32
  }
  func.func @transform_7(%arg0: i32) -> (i32, i32) {
    %c0_i32 = arith.constant 0 : i32
    %c0_i32_0 = arith.constant 0 : i32
    %c0_i32_1 = arith.constant 0 : i32
    return %c0_i32, %c0_i32_0 : i32, i32
  }
  func.func @transform_8(%arg0: i32) -> (i32, i32) {
    %c0_i32 = arith.constant 0 : i32
    %c0_i32_0 = arith.constant 0 : i32
    %c0_i32_1 = arith.constant 0 : i32
    return %c0_i32, %c0_i32_0 : i32, i32
  }
  func.func @transform_9(%arg0: i32) -> (i32, i32) {
    %c0_i32 = arith.constant 0 : i32
    %c0_i32_0 = arith.constant 0 : i32
    %c0_i32_1 = arith.constant 0 : i32
    return %c0_i32, %c0_i32_0 : i32, i32
  }
  func.func @transform_10(%arg0: i32) -> (i32, i32) {
    %c0_i32 = arith.constant 0 : i32
    %c0_i32_0 = arith.constant 0 : i32
    %c0_i32_1 = arith.constant 0 : i32
    return %c0_i32, %c0_i32_0 : i32, i32
  }
  func.func @transform_11(%arg0: i32) -> (i32, i32) {
    %c0_i32 = arith.constant 0 : i32
    %c0_i32_0 = arith.constant 0 : i32
    return %arg0, %c0_i32 : i32, i32
  }
}

module attributes {stable_mosaic.version = 11 : i64} {
  func.func @head_kernel(%arg0: i32, %arg1: memref<2x8x16xf32, #tpu.memory_space<vmem>>, %arg2: memref<2x8x16xf32, #tpu.memory_space<vmem>>, %arg3: memref<16x16xf32, #tpu.memory_space<vmem>>, %arg4: memref<16x16xf32, #tpu.memory_space<vmem>>, %arg5: memref<16x16xf32, #tpu.memory_space<vmem>>, %arg6: memref<16x16xf32, #tpu.memory_space<vmem>>, %arg7: memref<1x16xf32, #tpu.memory_space<vmem>>, %arg8: memref<1x16xf32, #tpu.memory_space<vmem>>, %arg9: memref<16x128xf32, #tpu.memory_space<vmem>>, %arg10: memref<16x128xf32, #tpu.memory_space<vmem>>, %arg11: memref<1x128xf32, #tpu.memory_space<vmem>>, %arg12: memref<2x128xf32, #tpu.memory_space<vmem>>) attributes {dimension_semantics = [#tpu.dimension_semantics<parallel>], iteration_bounds = array<i64: 1>, scalar_prefetch = 0 : i64, scratch_operands = 0 : i64, tpu.core_type = #tpu.core_type<tc>, window_params = [{transform_indices = @transform_0, window_bounds = array<i64: 2, 8, 16>}, {transform_indices = @transform_1, window_bounds = array<i64: 2, 8, 16>}, {pipeline_mode = #tpu.pipeline_mode<synchronous>, transform_indices = @transform_2, window_bounds = array<i64: 16, 16>}, {pipeline_mode = #tpu.pipeline_mode<synchronous>, transform_indices = @transform_3, window_bounds = array<i64: 16, 16>}, {pipeline_mode = #tpu.pipeline_mode<synchronous>, transform_indices = @transform_4, window_bounds = array<i64: 16, 16>}, {pipeline_mode = #tpu.pipeline_mode<synchronous>, transform_indices = @transform_5, window_bounds = array<i64: 16, 16>}, {pipeline_mode = #tpu.pipeline_mode<synchronous>, transform_indices = @transform_6, window_bounds = array<i64: 1, 16>}, {pipeline_mode = #tpu.pipeline_mode<synchronous>, transform_indices = @transform_7, window_bounds = array<i64: 1, 16>}, {pipeline_mode = #tpu.pipeline_mode<synchronous>, transform_indices = @transform_8, window_bounds = array<i64: 16, 128>}, {pipeline_mode = #tpu.pipeline_mode<synchronous>, transform_indices = @transform_9, window_bounds = array<i64: 16, 128>}, {pipeline_mode = #tpu.pipeline_mode<synchronous>, transform_indices = @transform_10, window_bounds = array<i64: 1, 128>}, {transform_indices = @transform_11, window_bounds = array<i64: 2, 128>}]} {
    %c0 = arith.constant 0 : index
    %c0_0 = arith.constant 0 : index
    %c0_1 = arith.constant 0 : index
    %0 = vector.load %arg1[%c0, %c0_0, %c0_1] : memref<2x8x16xf32, #tpu.memory_space<vmem>>, vector<2x8x16xf32>
    %c0_2 = arith.constant 0 : index
    %c0_3 = arith.constant 0 : index
    %c0_4 = arith.constant 0 : index
    %1 = vector.load %arg2[%c0_2, %c0_3, %c0_4] : memref<2x8x16xf32, #tpu.memory_space<vmem>>, vector<2x8x16xf32>
    %2 = vector.shape_cast %0 : vector<2x8x16xf32> to vector<16x16xf32>
    %3 = vector.shape_cast %1 : vector<2x8x16xf32> to vector<16x16xf32>
    %c0_5 = arith.constant 0 : index
    %c0_6 = arith.constant 0 : index
    %4 = vector.load %arg3[%c0_5, %c0_6] : memref<16x16xf32, #tpu.memory_space<vmem>>, vector<16x16xf32>
    %cst = arith.constant dense<0.000000e+00> : vector<16x16xf32>
    %5 = tpu.matmul %2, %4, %cst {dimension_numbers = #tpu.dot_dimension_numbers<[1], [0], [0], [1], [0, 0, 1, 1], [], []>} : vector<16x16xf32>, vector<16x16xf32>, vector<16x16xf32> -> vector<16x16xf32>
    %c0_7 = arith.constant 0 : index
    %c0_8 = arith.constant 0 : index
    %6 = vector.load %arg4[%c0_7, %c0_8] : memref<16x16xf32, #tpu.memory_space<vmem>>, vector<16x16xf32>
    %cst_9 = arith.constant dense<0.000000e+00> : vector<16x16xf32>
    %7 = tpu.matmul %3, %6, %cst_9 {dimension_numbers = #tpu.dot_dimension_numbers<[1], [0], [0], [1], [0, 0, 1, 1], [], []>} : vector<16x16xf32>, vector<16x16xf32>, vector<16x16xf32> -> vector<16x16xf32>
    %8 = arith.addf %5, %7 : vector<16x16xf32>
    %c0_10 = arith.constant 0 : index
    %c0_11 = arith.constant 0 : index
    %9 = vector.load %arg7[%c0_10, %c0_11] : memref<1x16xf32, #tpu.memory_space<vmem>>, vector<1x16xf32>
    %10 = vector.broadcast %9 : vector<1x16xf32> to vector<16x16xf32>
    %11 = arith.addf %8, %10 : vector<16x16xf32>
    %12 = vector.shape_cast %11 : vector<16x16xf32> to vector<2x8x16xf32>
    %c0_12 = arith.constant 0 : index
    %c0_13 = arith.constant 0 : index
    %13 = vector.load %arg5[%c0_12, %c0_13] : memref<16x16xf32, #tpu.memory_space<vmem>>, vector<16x16xf32>
    %cst_14 = arith.constant dense<0.000000e+00> : vector<16x16xf32>
    %14 = tpu.matmul %2, %13, %cst_14 {dimension_numbers = #tpu.dot_dimension_numbers<[1], [0], [0], [1], [0, 0, 1, 1], [], []>} : vector<16x16xf32>, vector<16x16xf32>, vector<16x16xf32> -> vector<16x16xf32>
    %c0_15 = arith.constant 0 : index
    %c0_16 = arith.constant 0 : index
    %15 = vector.load %arg6[%c0_15, %c0_16] : memref<16x16xf32, #tpu.memory_space<vmem>>, vector<16x16xf32>
    %cst_17 = arith.constant dense<0.000000e+00> : vector<16x16xf32>
    %16 = tpu.matmul %3, %15, %cst_17 {dimension_numbers = #tpu.dot_dimension_numbers<[1], [0], [0], [1], [0, 0, 1, 1], [], []>} : vector<16x16xf32>, vector<16x16xf32>, vector<16x16xf32> -> vector<16x16xf32>
    %17 = arith.addf %14, %16 : vector<16x16xf32>
    %c0_18 = arith.constant 0 : index
    %c0_19 = arith.constant 0 : index
    %18 = vector.load %arg8[%c0_18, %c0_19] : memref<1x16xf32, #tpu.memory_space<vmem>>, vector<1x16xf32>
    %19 = vector.broadcast %18 : vector<1x16xf32> to vector<16x16xf32>
    %20 = arith.addf %17, %19 : vector<16x16xf32>
    %21 = vector.shape_cast %20 : vector<16x16xf32> to vector<2x8x16xf32>
    %cst_20 = arith.constant dense<0xFF800000> : vector<2x16xf32>
    %22 = vector.multi_reduction <maximumf>, %12, %cst_20 [1] : vector<2x8x16xf32> to vector<2x16xf32>
    %23 = vector.shape_cast %22 : vector<2x16xf32> to vector<2x1x16xf32>
    %24 = vector.broadcast %23 : vector<2x1x16xf32> to vector<2x8x16xf32>
    %25 = arith.subf %12, %24 : vector<2x8x16xf32>
    %26 = math.exp %25 : vector<2x8x16xf32>
    %cst_21 = arith.constant dense<0xFF800000> : vector<2x16xf32>
    %27 = vector.multi_reduction <maximumf>, %21, %cst_21 [1] : vector<2x8x16xf32> to vector<2x16xf32>
    %28 = vector.shape_cast %27 : vector<2x16xf32> to vector<2x1x16xf32>
    %29 = vector.broadcast %28 : vector<2x1x16xf32> to vector<2x8x16xf32>
    %30 = arith.subf %21, %29 : vector<2x8x16xf32>
    %31 = math.exp %30 : vector<2x8x16xf32>
    %cst_22 = arith.constant dense<0.000000e+00> : vector<2x16xf32>
    %32 = vector.multi_reduction <add>, %26, %cst_22 [1] : vector<2x8x16xf32> to vector<2x16xf32>
    %33 = tpu.reciprocal %32 : vector<2x16xf32> -> vector<2x16xf32>
    %cst_23 = arith.constant dense<0.000000e+00> : vector<2x16xf32>
    %34 = vector.multi_reduction <add>, %31, %cst_23 [1] : vector<2x8x16xf32> to vector<2x16xf32>
    %35 = tpu.reciprocal %34 : vector<2x16xf32> -> vector<2x16xf32>
    %36 = arith.mulf %26, %0 : vector<2x8x16xf32>
    %cst_24 = arith.constant dense<0xFF800000> : vector<2x16xf32>
    %37 = vector.multi_reduction <maximumf>, %36, %cst_24 [1] : vector<2x8x16xf32> to vector<2x16xf32>
    %38 = arith.mulf %33, %37 : vector<2x16xf32>
    %39 = arith.mulf %31, %1 : vector<2x8x16xf32>
    %cst_25 = arith.constant dense<0xFF800000> : vector<2x16xf32>
    %40 = vector.multi_reduction <maximumf>, %39, %cst_25 [1] : vector<2x8x16xf32> to vector<2x16xf32>
    %41 = arith.mulf %35, %40 : vector<2x16xf32>
    %c0_26 = arith.constant 0 : index
    %c0_27 = arith.constant 0 : index
    %42 = vector.load %arg9[%c0_26, %c0_27] : memref<16x128xf32, #tpu.memory_space<vmem>>, vector<16x128xf32>
    %cst_28 = arith.constant dense<0.000000e+00> : vector<2x128xf32>
    %43 = tpu.matmul %38, %42, %cst_28 {dimension_numbers = #tpu.dot_dimension_numbers<[1], [0], [0], [1], [0, 0, 1, 1], [], []>} : vector<2x16xf32>, vector<16x128xf32>, vector<2x128xf32> -> vector<2x128xf32>
    %c0_29 = arith.constant 0 : index
    %c0_30 = arith.constant 0 : index
    %44 = vector.load %arg10[%c0_29, %c0_30] : memref<16x128xf32, #tpu.memory_space<vmem>>, vector<16x128xf32>
    %cst_31 = arith.constant dense<0.000000e+00> : vector<2x128xf32>
    %45 = tpu.matmul %41, %44, %cst_31 {dimension_numbers = #tpu.dot_dimension_numbers<[1], [0], [0], [1], [0, 0, 1, 1], [], []>} : vector<2x16xf32>, vector<16x128xf32>, vector<2x128xf32> -> vector<2x128xf32>
    %46 = arith.addf %43, %45 : vector<2x128xf32>
    %c0_32 = arith.constant 0 : index
    %c0_33 = arith.constant 0 : index
    %47 = vector.load %arg11[%c0_32, %c0_33] : memref<1x128xf32, #tpu.memory_space<vmem>>, vector<1x128xf32>
    %48 = vector.broadcast %47 : vector<1x128xf32> to vector<2x128xf32>
    %49 = arith.addf %46, %48 : vector<2x128xf32>
    %c0_34 = arith.constant 0 : index
    %c0_35 = arith.constant 0 : index
    %50 = vector.load %arg12[%c0_34, %c0_35] : memref<2x128xf32, #tpu.memory_space<vmem>>, vector<2x128xf32>
    tpu.vector_store %arg12[%c0_34, %c0_35], %49 {strides = array<i32>} : memref<2x128xf32, #tpu.memory_space<vmem>>, vector<2x128xf32>,
    return
  }
  func.func @transform_0(%arg0: i32) -> (i32, i32, i32) {
    %c0_i32 = arith.constant 0 : i32
    %c0_i32_0 = arith.constant 0 : i32
    %c0_i32_1 = arith.constant 0 : i32
    return %arg0, %c0_i32, %c0_i32_0 : i32, i32, i32
  }
  func.func @transform_1(%arg0: i32) -> (i32, i32, i32) {
    %c0_i32 = arith.constant 0 : i32
    %c0_i32_0 = arith.constant 0 : i32
    %c0_i32_1 = arith.constant 0 : i32
    return %arg0, %c0_i32, %c0_i32_0 : i32, i32, i32
  }
  func.func @transform_2(%arg0: i32) -> (i32, i32) {
    %c0_i32 = arith.constant 0 : i32
    %c0_i32_0 = arith.constant 0 : i32
    %c0_i32_1 = arith.constant 0 : i32
    return %c0_i32, %c0_i32_0 : i32, i32
  }
  func.func @transform_3(%arg0: i32) -> (i32, i32) {
    %c0_i32 = arith.constant 0 : i32
    %c0_i32_0 = arith.constant 0 : i32
    %c0_i32_1 = arith.constant 0 : i32
    return %c0_i32, %c0_i32_0 : i32, i32
  }
  func.func @transform_4(%arg0: i32) -> (i32, i32) {
    %c0_i32 = arith.constant 0 : i32
    %c0_i32_0 = arith.constant 0 : i32
    %c0_i32_1 = arith.constant 0 : i32
    return %c0_i32, %c0_i32_0 : i32, i32
  }
  func.func @transform_5(%arg0: i32) -> (i32, i32) {
    %c0_i32 = arith.constant 0 : i32
    %c0_i32_0 = arith.constant 0 : i32
    %c0_i32_1 = arith.constant 0 : i32
    return %c0_i32, %c0_i32_0 : i32, i32
  }
  func.func @transform_6(%arg0: i32) -> (i32, i32) {
    %c0_i32 = arith.constant 0 : i32
    %c0_i32_0 = arith.constant 0 : i32
    %c0_i32_1 = arith.constant 0 : i32
    return %c0_i32, %c0_i32_0 : i32, i32
  }
  func.func @transform_7(%arg0: i32) -> (i32, i32) {
    %c0_i32 = arith.constant 0 : i32
    %c0_i32_0 = arith.constant 0 : i32
    %c0_i32_1 = arith.constant 0 : i32
    return %c0_i32, %c0_i32_0 : i32, i32
  }
  func.func @transform_8(%arg0: i32) -> (i32, i32) {
    %c0_i32 = arith.constant 0 : i32
    %c0_i32_0 = arith.constant 0 : i32
    %c0_i32_1 = arith.constant 0 : i32
    return %c0_i32, %c0_i32_0 : i32, i32
  }
  func.func @transform_9(%arg0: i32) -> (i32, i32) {
    %c0_i32 = arith.constant 0 : i32
    %c0_i32_0 = arith.constant 0 : i32
    %c0_i32_1 = arith.constant 0 : i32
    return %c0_i32, %c0_i32_0 : i32, i32
  }
  func.func @transform_10(%arg0: i32) -> (i32, i32) {
    %c0_i32 = arith.constant 0 : i32
    %c0_i32_0 = arith.constant 0 : i32
    %c0_i32_1 = arith.constant 0 : i32
    return %c0_i32, %c0_i32_0 : i32, i32
  }
  func.func @transform_11(%arg0: i32) -> (i32, i32) {
    %c0_i32 = arith.constant 0 : i32
    %c0_i32_0 = arith.constant 0 : i32
    return %arg0, %c0_i32 : i32, i32
  }
}

</mosaic_0001>

<bundles_post_ra>
// kernel: tpu_custom_call.1
= control target key start
LH: loop header
LB: loop body
LE: loop exit
PB: predicated region body
PF: predicated region fallthrough
CT: control target
= control target key end

     0   :  { %16 = vsyncpa [#allocation3], 0  ;;  %s1307_s0 = inlined_call_operand.hbm [shape: f32[2,8,16], index: 0, kind: input, shape index: {}]   ;;  %s1308_s1 = inlined_call_operand.hbm [shape: f32[2,8,16], index: 1, kind: input, shape index: {}]   ;;  %s1309_s2 = inlined_call_operand.hbm [shape: f32[16,16], index: 2, kind: input, shape index: {}]   ;;  %s1310_s3 = inlined_call_operand.hbm [shape: f32[16,16], index: 3, kind: input, shape index: {}]   ;;  %s1311_s4 = inlined_call_operand.hbm [shape: f32[16,16], index: 4, kind: input, shape index: {}]   ;;  %s1312_s5 = inlined_call_operand.vmem [shape: f32[16,16], index: 5, kind: input, shape index: {}]   ;;  %s1313_s6 = inlined_call_operand.vmem [shape: f32[1,16], index: 6, kind: input, shape index: {}]   ;;  %s1314_s7 = inlined_call_operand.vmem [shape: f32[1,16], index: 7, kind: input, shape index: {}]   ;;  %s1315_s8 = inlined_call_operand.hbm [shape: f32[16,128], index: 8, kind: input, shape index: {}]   ;;  %s1316_s9 = inlined_call_operand.vmem [shape: f32[16,128], index: 9, kind: input, shape index: {}]   ;;  %s1317_s10 = inlined_call_operand.vmem [shape: f32[1,128], index: 10, kind: input, shape index: {}]   ;;  %s1318_s11 = inlined_call_operand.hbm [shape: f32[2,128], index: 11, kind: output, shape index: {}]  }
   0x1   :  { %17 = vsyncpa [#allocation6], 0 }
   0x2   :  { %18 = vsyncpa [#allocation9], 0 }
   0x3   :  { %19 = vsyncpa [#allocation12], 0 }
   0x4   :  { %20 = vsyncpa [#allocation4], 0  ;;  %s1049_s17 = smov [#allocation5]   ;;  %s1050_s19 = smov [#allocation8]  }
   0x5   :  { %s38_s18 = sshll.u32 %s1049_s17, 4  ;;  %s62_s20 = sshll.u32 %s1050_s19, 4  ;;  %s39_s18 = int_to_ptr.vmem [resolvable:$true] %s38_s18  ;;  %s1121_s20 = int_to_ptr.vmem [resolvable:$true] %s62_s20 }
   0x6   :  { %s885_s23 = scalar_lea.hbm %s1308_s1, 256 }
   0x7   :  { %p886_p0 = scmp.ne.s32.totalorder %s1308_s1, %s885_s23  ;;  %p889_p1 = scmp.lt.u32.totalorder %s885_s23, %s1308_s1 }
   0x9   :  { %p891_p2 = pnand %p889_p1, %p886_p0 }
   0xb   :  { %894 = shalt.err (!%p891_p2)
}
   0xc   :  { %s895_s28 = scalar_lea.vmem %s39_s18, 256  ;;  %p900_p4 = scmp.lt.s32.totalorder %s39_s18, %s39_s18 }
   0xd   :  { %p896_p3 = scmp.ne.s32.totalorder %s39_s18, %s895_s28  ;;  %p901_p5 = scmp.lt.s32.totalorder %s895_s28, %s895_s28 }
   0xf   :  { %p902_p6 = por %p901_p5, %p900_p4 }
  0x11   :  { %p903_p7 = pnand %p902_p6, %p896_p3 }
  0x13   :  { %906 = shalt.err (!%p903_p7)
}
  0x14   :  { %s1051_s29 = smov 128   ;;  %s1052_s30 = smov 8  }
  0x15   :  { %44 = dma.hbm_to_vmem [thread:$0]  %s1308_s1, 256, %s39_s18, [#allocation6], %s1051_s29, %s1051_s29, %s1052_s30  }
  0x16   :  { %s907_s16 = scalar_lea.hbm %s1310_s3, 256 }
  0x17   :  { %p908_p8 = scmp.ne.s32.totalorder %s1310_s3, %s907_s16  ;;  %p911_p9 = scmp.lt.u32.totalorder %s907_s16, %s1310_s3 }
  0x19   :  { %p913_p10 = pnand %p911_p9, %p908_p8 }
  0x1b   :  { %916 = shalt.err (!%p913_p10)
}
  0x1c   :  { %s917_s23 = scalar_lea.vmem %s1121_s20, 256  ;;  %p922_p12 = scmp.lt.s32.totalorder %s1121_s20, %s1121_s20 }
  0x1d   :  { %p918_p11 = scmp.ne.s32.totalorder %s1121_s20, %s917_s23  ;;  %p923_p13 = scmp.lt.s32.totalorder %s917_s23, %s917_s23 }
  0x1f   :  { %p924_p0 = por %p923_p13, %p922_p12 }
  0x21   :  { %p925_p1 = pnand %p924_p0, %p918_p11 }
  0x23   :  { %928 = shalt.err (!%p925_p1)
}
  0x24   :  { %68 = dma.hbm_to_vmem [thread:$0]  %s1310_s3, 256, %s1121_s20, [#allocation9], %s1051_s29, %s1051_s29, %s1052_s30  }
  0x25   :  { %s1053_s24 = smov [#allocation2]   ;;  %s1054_s26 = smov [#allocation7]  }
  0x26   :  { %s26_s25 = sshll.u32 %s1053_s24, 4  ;;  %s50_s27 = sshll.u32 %s1054_s26, 4  ;;  %s27_s25 = int_to_ptr.vmem [resolvable:$true] %s26_s25  ;;  %s1158_s27 = int_to_ptr.vmem [resolvable:$true] %s50_s27 }
  0x27   :  { %s929_s13 = scalar_lea.hbm %s1307_s0, 256 }
  0x28   :  { %p930_p2 = scmp.ne.s32.totalorder %s1307_s0, %s929_s13  ;;  %p933_p3 = scmp.lt.u32.totalorder %s929_s13, %s1307_s0 }
  0x2a   :  { %p935_p4 = pnand %p933_p3, %p930_p2 }
  0x2c   :  { %938 = shalt.err (!%p935_p4)
}
  0x2d   :  { %s939_s3 = scalar_lea.vmem %s27_s25, 256  ;;  %p944_p6 = scmp.lt.s32.totalorder %s27_s25, %s27_s25 }
  0x2e   :  { %p940_p5 = scmp.ne.s32.totalorder %s27_s25, %s939_s3  ;;  %p945_p7 = scmp.lt.s32.totalorder %s939_s3, %s939_s3 }
  0x30   :  { %p946_p8 = por %p945_p7, %p944_p6 }
  0x32   :  { %p947_p9 = pnand %p946_p8, %p940_p5 }
  0x34   :  { %950 = shalt.err (!%p947_p9)
}
  0x35   :  { %32 = dma.hbm_to_vmem [thread:$0]  %s1307_s0, 256, %s27_s25, [#allocation3], %s1051_s29, %s1051_s29, %s1052_s30  }
  0x36   :  { %s951_s23 = scalar_lea.hbm %s1309_s2, 256 }
  0x37   :  { %p952_p10 = scmp.ne.s32.totalorder %s1309_s2, %s951_s23  ;;  %p955_p11 = scmp.lt.u32.totalorder %s951_s23, %s1309_s2 }
  0x39   :  { %p957_p12 = pnand %p955_p11, %p952_p10 }
  0x3b   :  { %960 = shalt.err (!%p957_p12)
}
  0x3c   :  { %s961_s28 = scalar_lea.vmem %s1158_s27, 256  ;;  %p966_p0 = scmp.lt.s32.totalorder %s1158_s27, %s1158_s27 }
  0x3d   :  { %p962_p13 = scmp.ne.s32.totalorder %s1158_s27, %s961_s28  ;;  %p967_p1 = scmp.lt.s32.totalorder %s961_s28, %s961_s28 }
  0x3f   :  { %p968_p2 = por %p967_p1, %p966_p0 }
  0x41   :  { %p969_p3 = pnand %p968_p2, %p962_p13 }
  0x43   :  { %972 = shalt.err (!%p969_p3)
}
  0x44   :  { %56 = dma.hbm_to_vmem [thread:$0]  %s1309_s2, 256, %s1158_s27, [#allocation6], %s1051_s29, %s1051_s29, %s1052_s30  }
  0x45   :  { %s1055_s12 = smov [#allocation10]   ;;  %s1056_s14 = smov [#allocation11]  }
  0x46   :  { %s74_s13 = sshll.u32 %s1055_s12, 4  ;;  %s92_s15 = sshll.u32 %s1056_s14, 4  ;;  %s75_s13 = int_to_ptr.vmem [resolvable:$true] %s74_s13  ;;  %s1195_s15 = int_to_ptr.vmem [resolvable:$true] %s92_s15 }
  0x47   :  { %s973_s3 = scalar_lea.hbm %s1311_s4, 256 }
  0x48   :  { %p974_p4 = scmp.ne.s32.totalorder %s1311_s4, %s973_s3  ;;  %p977_p5 = scmp.lt.u32.totalorder %s973_s3, %s1311_s4 }
  0x4a   :  { %p979_p6 = pnand %p977_p5, %p974_p4 }
  0x4c   :  { %982 = shalt.err (!%p979_p6)
}
  0x4d   :  { %s983_s2 = scalar_lea.vmem %s75_s13, 256  ;;  %p988_p8 = scmp.lt.s32.totalorder %s75_s13, %s75_s13 }
  0x4e   :  { %p984_p7 = scmp.ne.s32.totalorder %s75_s13, %s983_s2  ;;  %p989_p9 = scmp.lt.s32.totalorder %s983_s2, %s983_s2 }
  0x50   :  { %p990_p10 = por %p989_p9, %p988_p8 }
  0x52   :  { %p991_p11 = pnand %p990_p10, %p984_p7 }
  0x54   :  { %994 = shalt.err (!%p991_p11)
}
  0x55   :  { %80 = dma.hbm_to_vmem [thread:$0]  %s1311_s4, 256, %s75_s13, [#allocation9], %s1051_s29, %s1051_s29, %s1052_s30  }
  0x56   :  { %s995_s24 = scalar_lea.hbm %s1315_s8, 256 }
  0x57   :  { %p996_p12 = scmp.ne.s32.totalorder %s1315_s8, %s995_s24  ;;  %p999_p13 = scmp.lt.u32.totalorder %s995_s24, %s1315_s8 }
  0x59   :  { %p1001_p0 = pnand %p999_p13, %p996_p12 }
  0x5b   :  { %1004 = shalt.err (!%p1001_p0)
}
  0x5c   :  { %s1005_s12 = scalar_lea.vmem %s1195_s15, 256  ;;  %p1010_p2 = scmp.lt.s32.totalorder %s1195_s15, %s1195_s15 }
  0x5d   :  { %p1006_p1 = scmp.ne.s32.totalorder %s1195_s15, %s1005_s12  ;;  %p1011_p3 = scmp.lt.s32.totalorder %s1005_s12, %s1005_s12 }
  0x5f   :  { %p1012_p4 = por %p1011_p3, %p1010_p2 }
  0x61   :  { %p1013_p5 = pnand %p1012_p4, %p1006_p1 }
  0x63   :  { %1016 = shalt.err (!%p1013_p5)
}
  0x64   :  { %98 = dma.hbm_to_vmem [thread:$0]  %s1315_s8, 256, %s1195_s15, [#allocation12], %s1051_s29, %s1051_s29, %s1052_s30  }
  0x65   :  { %1039 = dma.done.wait [#allocation3], 256  }
  0x66   :  { %1040 = vsyncadd [#allocation3], 4294967040 }
  0x67   :  { %1041 = dma.done.wait [#allocation6], 512  }
  0x68   :  { %1042 = vsyncadd [#allocation6], 4294966784 }
  0x69   :  { %1043 = dma.done.wait [#allocation9], 512  }
  0x6a   :  { %1044 = vsyncadd [#allocation9], 4294966784 }
  0x6b   :  { %1045 = dma.done.wait [#allocation12], 256  }
  0x6c   :  { %1046 = vsyncadd [#allocation12], 4294967040  ;;  %vm129_vm0 = vcmask 130048   ;;  %v127_v0 = vld [vmem:[#allocation8] sm:$0xff]  ;;  %v128_v1 = vld [vmem:[#allocation8 + $0x8] sm:$0xff]  ;;  %v1057_v19 = vmov 0.0|0.0  }
  0x6d   :  { %v303_v2 = vld [vmem:[%s1312_s5] sm:$0xff]  ;;  %v831_v3 = vpack.c.bf16 %v128_v1, %v127_v0  ;;  %v304_v4 = vld [vmem:[%s1312_s5 + $0x8] sm:$0xff]  ;;  %v1238_v5 = vld [vmem:[#allocation5] sm:$0xff]  ;;  %vm1058_vm1 = vmmov 0   ;;  %v1059_v23 = vmov 0.0   ;;  %vm578_vm2 = vcmask 1041409  }
  0x6e   :  { %v839_v6 = vpack.c.bf16 %v304_v4, %v303_v2  ;;  %793 = vmatprep.mubr.msk.f32.mxu0 %vm129_vm0, %v1238_v5  ;;  %807 = vmatprep.mubr.msk.f32.mxu1 %vm129_vm0, %v1238_v5  ;;  %v125_v7 = vld [vmem:[#allocation7] sm:$0xff]  ;;  %v126_v8 = vld [vmem:[#allocation7 + $0x8] sm:$0xff]  ;;  %v1244_v12 = vld [vmem:[#allocation5 + $0x8] sm:$0xff] }
  0x6f   :  { %v301_v9 = vld [vmem:[#allocation10] sm:$0xff]  ;;  %832 = vmatprep.subr.bf16.mxu0 %v831_v3  ;;  %v835_v10 = vpack.c.bf16 %v126_v8, %v125_v7  ;;  %v302_v11 = vld [vmem:[#allocation10 + $0x8] sm:$0xff]  ;;  %v572_v18 = vld [vmem:[#allocation11] sm:$0xff] }
  0x70   :  { %840 = vmatprep.subr.bf16.mxu1 %v839_v6  ;;  %834 = vmatpush3.bf16.msra.mxu0 %v831_v3  ;;  %v843_v13 = vpack.c.bf16 %v302_v11, %v301_v9  ;;  %v1246_v14 = vld [vmem:[#allocation2] sm:$0xff]  ;;  %v1256_v15 = vld [vmem:[#allocation2 + $0x8] sm:$0xff]  ;;  %v573_v21 = vld [vmem:[#allocation11 + $0x8] sm:$0xff] }
  0x71   :  { %842 = vmatpush3.bf16.msra.mxu1 %v839_v6  ;;  %836 = vmatprep.subr.bf16.mxu0 %v835_v10  ;;  %v574_v16 = vld [vmem:[%s1316_s9] sm:$0xff]  ;;  %v575_v17 = vld [vmem:[%s1316_s9 + $0x8] sm:$0xff]  ;;  %v851_v22 = vpack.c.bf16 %v573_v21, %v572_v18  ;;  %s1060_s9 = smov [#allocation13]  }
  0x72   :  { %844 = vmatprep.subr.bf16.mxu1 %v843_v13  ;;  %v848_v20 = vpack.c.bf16 %v575_v17, %v574_v16  ;;  %v758_v24 = vld [vmem:[%s1313_s6] ss:$0 sm:$0xff]  ;;  %s742_s22 = sshll.u32 %s1060_s9, 4  ;;  %s743_s22 = int_to_ptr.vmem [resolvable:$true] %s742_s22 }
  0x73   :  { %794 = vmatmul.mubr.msk.f32.vlgmr.msra.gmra.mrb[0].mxu0 %vm129_vm0, %v1244_v12  ;;  %v763_v25 = vld [vmem:[%s1314_s7] ss:$0 sm:$0xff]  ;;  %s1017_s2 = scalar_lea.vmem %s743_s22, 32  ;;  %p1022_p7 = scmp.lt.s32.totalorder %s743_s22, %s743_s22 }
  0x74   :  { %808 = vmatmul.mubr.msk.f32.vlgmr.msra.gmra.mrb[0].mxu1 %vm129_vm0, %v1244_v12  ;;  %838 = vmatpush3.bf16.msra.mxu0 %v835_v10  ;;  %p1018_p6 = scmp.ne.s32.totalorder %s743_s22, %s1017_s2  ;;  %p1023_p8 = scmp.lt.s32.totalorder %s1017_s2, %s1017_s2 }
  0x75   :  { %846 = vmatpush3.bf16.msra.mxu1 %v843_v13  ;;  %800 = vmatprep.mubr.msk.f32.mxu0 %vm129_vm0, %v1246_v14 }
  0x76   :  { %814 = vmatprep.mubr.msk.f32.mxu1 %vm129_vm0, %v1246_v14  ;;  %847 = vmatprep.subr.bf16.mxu0 %v1057_v19  ;;  %p1024_p9 = por %p1023_p8, %p1022_p7 }
  0x77   :  { %850 = vmatprep.subr.bf16.mxu1 %v1057_v19 }
  0x78   :  { %p1025_p10 = pnand %p1024_p9, %p1018_p6 }
  0x7b   :  { %801 = vmatmul.mubr.msk.f32.vlgmr.msra.gmra.mrb[0].mxu0 %vm129_vm0, %v1256_v15 }
  0x7c   :  { %815 = vmatmul.mubr.msk.f32.vlgmr.msra.gmra.mrb[0].mxu1 %vm129_vm0, %v1256_v15  ;;  %821 = vmatprep.mubr.msk.f32.mxu0 %vm1058_vm1, %v1059_v23 }
  0x7d   :  { %828 = vmatprep.mubr.msk.f32.mxu1 %vm1058_vm1, %v1059_v23  ;;  %849 = vmatpush3.bf16.msra.mxu0 %v848_v20 }
  0x7e   :  { %852 = vmatpush3.bf16.msra.mxu1 %v851_v22 }
 0x14e   :  { %v802_v26 = vpop.f32.mrb[0].mxu0 }
 0x14f   :  { %v300_v27 = vadd.f32 %v802_v26, %v758_v24  ;;  %v816_v28 = vpop.f32.mrb[0].mxu1  ;;  %v283_v29 = vpop.f32.mrb[1].mxu0 }
 0x150   :  { %v463_v30 = vadd.f32 %v816_v28, %v763_v25  ;;  %v299_v31 = vadd.f32 %v758_v24, %v283_v29  ;;  %v446_v32 = vpop.f32.mrb[1].mxu1 }
 0x151   :  { %v471_v33 = vsel %vm129_vm0, %v300_v27, -inf  ;;  %v462_v34 = vadd.f32 %v763_v25, %v446_v32 }
 0x152   :  { %v472_v35 = vrot.slane %v471_v33, 4  ;;  %v491_v36 = vsel %vm129_vm0, %v463_v30, -inf  ;;  %v464_v37 = vsel %vm129_vm0, %v299_v31, -inf }
 0x153   :  { %v492_v38 = vrot.slane %v491_v36, 4  ;;  %v465_v39 = vrot.slane %v464_v37, 4  ;;  %v484_v40 = vsel %vm129_vm0, %v462_v34, -inf }
 0x154   :  { %v473_v41 = vmax.f32 %v471_v33, %v472_v35  ;;  %v485_v42 = vrot.slane %v484_v40, 4 }
 0x155   :  { %v493_v43 = vmax.f32 %v491_v36, %v492_v38  ;;  %v466_v44 = vmax.f32 %v464_v37, %v465_v39 }
 0x156   :  { %v474_v45 = vrot.slane %v473_v41, 2  ;;  %v486_v46 = vmax.f32 %v484_v40, %v485_v42 }
 0x157   :  { %v494_v47 = vrot.slane %v493_v43, 2  ;;  %v467_v48 = vrot.slane %v466_v44, 2 }
 0x158   :  { %v475_v49 = vmax.f32 %v473_v41, %v474_v45  ;;  %v487_v50 = vrot.slane %v486_v46, 2 }
 0x159   :  { %v495_v51 = vmax.f32 %v493_v43, %v494_v47  ;;  %v468_v52 = vmax.f32 %v466_v44, %v467_v48 }
 0x15a   :  { %v476_v53 = vrot.slane %v475_v49, 1  ;;  %v488_v54 = vmax.f32 %v486_v46, %v487_v50 }
 0x15b   :  { %v496_v55 = vrot.slane %v495_v51, 1  ;;  %v469_v56 = vrot.slane %v468_v52, 1 }
 0x15c   :  { %v477_v57 = vmax.f32 %v475_v49, %v476_v53  ;;  %v489_v58 = vrot.slane %v488_v54, 1 }
 0x15d   :  { %v497_v59 = vmax.f32 %v495_v51, %v496_v55  ;;  %v470_v60 = vmax.f32 %v468_v52, %v469_v56 }
 0x15e   :  { %v479_v61 = vsub.f32 %v300_v27, %v477_v57  ;;  %v490_v62 = vmax.f32 %v488_v54, %v489_v58 }
 0x15f   :  { %v499_v63 = vsub.f32 %v463_v30, %v497_v59  ;;  %v478_v0 = vsub.f32 %v299_v31, %v470_v60 }
 0x160   :  { %v482_v1 = vmul.f32 1.442695, %v479_v61  ;;  %v498_v2 = vsub.f32 %v462_v34, %v490_v62 }
 0x161   :  { %v502_v3 = vmul.f32 1.442695, %v499_v63  ;;  %v480_v4 = vmul.f32 1.442695, %v478_v0 }
 0x162   :  { %869 = vpow2.f32 %v482_v1  ;;  %v500_v6 = vmul.f32 1.442695, %v498_v2 }
 0x163   :  { %871 = vpow2.f32 %v502_v3 }
 0x164   :  { %873 = vpow2.f32 %v480_v4 }
 0x165   :  { %875 = vpow2.f32 %v500_v6 }
 0x16c   :  { %v870_v7 = vpop.eup %869 }
 0x16d   :  { %v872_v8 = vpop.eup %871  ;;  %v511_v9 = vsel %vm129_vm0, %v870_v7, 0.0  ;;  %v537_v10 = vmul.f32 %v870_v7, %v1256_v15 }
 0x16e   :  { %v874_v11 = vpop.eup %873  ;;  %v512_v13 = vrot.slane %v511_v9, 4  ;;  %v527_v16 = vsel %vm129_vm0, %v872_v8, 0.0  ;;  %v555_v17 = vmul.f32 %v872_v8, %v1244_v12 }
 0x16f   :  { %v876_v18 = vpop.eup %875  ;;  %v545_v19 = vsel %vm129_vm0, %v537_v10, -inf  ;;  %v528_v20 = vrot.slane %v527_v16, 4  ;;  %v504_v21 = vsel %vm129_vm0, %v874_v11, 0.0  ;;  %v536_v22 = vmul.f32 %v874_v11, %v1246_v14 }
 0x170   :  { %v513_v23 = vadd.f32 %v512_v13, %v511_v9  ;;  %v546_v24 = vrot.slane %v545_v19, 4  ;;  %v563_v25 = vsel %vm129_vm0, %v555_v17, -inf  ;;  %v505_v26 = vrot.slane %v504_v21, 4 }
 0x171   :  { %v529_v15 = vadd.f32 %v528_v20, %v527_v16  ;;  %v564_v27 = vrot.slane %v563_v25, 4  ;;  %v538_v28 = vsel %vm129_vm0, %v536_v22, -inf  ;;  %v520_v29 = vsel %vm129_vm0, %v876_v18, 0.0 }
 0x172   :  { %v514_v12 = vrot.slane %v513_v23, 2  ;;  %v506_v30 = vadd.f32 %v505_v26, %v504_v21  ;;  %v539_v31 = vrot.slane %v538_v28, 4  ;;  %v521_v32 = vrot.slane %v520_v29, 4 }
 0x173   :  { %v530_v33 = vrot.slane %v529_v15, 2  ;;  %v554_v34 = vmul.f32 %v876_v18, %v1238_v5  ;;  %v547_v35 = vmax.f32 %v545_v19, %v546_v24  ;;  %v565_v40 = vmax.f32 %v563_v25, %v564_v27 }
 0x174   :  { %v515_v14 = vadd.f32 %v514_v12, %v513_v23  ;;  %v507_v36 = vrot.slane %v506_v30, 2  ;;  %v522_v37 = vadd.f32 %v521_v32, %v520_v29  ;;  %v540_v41 = vmax.f32 %v538_v28, %v539_v31  ;;  %v766_v23 = vld [vmem:[%s1317_s10] ss:$0 sm:$0xff] }
 0x175   :  { %v531_v38 = vadd.f32 %v530_v33, %v529_v15  ;;  %v556_v39 = vsel %vm129_vm0, %v554_v34, -inf  ;;  %v548_v47 = vrot.slane %v547_v35, 2  ;;  %v566_v52 = vrot.slane %v565_v40, 2 }
 0x176   :  { %v516_v42 = vrot.slane %v515_v14, 1  ;;  %v508_v43 = vadd.f32 %v507_v36, %v506_v30  ;;  %v523_v44 = vrot.slane %v522_v37, 2  ;;  %v557_v45 = vrot.slane %v556_v39, 4 }
 0x177   :  { %v532_v46 = vrot.slane %v531_v38, 1  ;;  %v541_v53 = vrot.slane %v540_v41, 2  ;;  %v549_v57 = vmax.f32 %v547_v35, %v548_v47  ;;  %v567_v59 = vmax.f32 %v565_v40, %v566_v52 }
 0x178   :  { %v517_v48 = vadd.f32 %v516_v42, %v515_v14  ;;  %v509_v49 = vrot.slane %v508_v43, 1  ;;  %v524_v50 = vadd.f32 %v523_v44, %v522_v37  ;;  %v558_v51 = vmax.f32 %v556_v39, %v557_v45 }
 0x179   :  { %v533_v5 = vadd.f32 %v532_v46, %v531_v38  ;;  %v542_v60 = vmax.f32 %v540_v41, %v541_v53  ;;  %v550_v62 = vrot.slane %v549_v57, 1  ;;  %v568_v63 = vrot.slane %v567_v59, 1 }
 0x17a   :  { %877 = vrcp.f32 %v517_v48  ;;  %v510_v54 = vadd.f32 %v509_v49, %v508_v43  ;;  %v525_v55 = vrot.slane %v524_v50, 1  ;;  %v559_v56 = vrot.slane %v558_v51, 2 }
 0x17b   :  { %879 = vrcp.f32 %v533_v5  ;;  %v543_v0 = vrot.slane %v542_v60, 1  ;;  %v551_v2 = vmax.f32 %v549_v57, %v550_v62  ;;  %v569_v6 = vmax.f32 %v567_v59, %v568_v63 }
 0x17c   :  { %881 = vrcp.f32 %v510_v54  ;;  %v526_v58 = vadd.f32 %v525_v55, %v524_v50  ;;  %v560_v61 = vmax.f32 %v558_v51, %v559_v56 }
 0x17d   :  { %v544_v7 = vmax.f32 %v542_v60, %v543_v0 }
 0x17e   :  { %883 = vrcp.f32 %v526_v58  ;;  %v561_v1 = vrot.slane %v560_v61, 1 }
 0x180   :  { %v562_v10 = vmax.f32 %v560_v61, %v561_v1 }
 0x184   :  { %v878_v3 = vpop.eup %877 }
 0x185   :  { %v880_v4 = vpop.eup %879  ;;  %v553_v8 = vmul.f32 %v878_v3, %v551_v2 }
 0x186   :  { %v882_v9 = vpop.eup %881  ;;  %v571_v11 = vmul.f32 %v880_v4, %v569_v6 }
 0x187   :  { %v552_v13 = vmul.f32 %v882_v9, %v544_v7 }
 0x188   :  { %v884_v16 = vpop.eup %883 }
 0x189   :  { %v570_v17 = vmul.f32 %v884_v16, %v562_v10  ;;  %v654_v18 = vsel %vm578_vm2, %v553_v8, %v552_v13 }
 0x18a   :  { %829 = vmatmul.mubr.msk.f32.vlgmr.msra.gmra.mrb[2].mxu1 %vm129_vm0, %v654_v18 }
 0x18b   :  { %v579_v19 = vsel %vm578_vm2, %v571_v11, %v570_v17 }
 0x18c   :  { %822 = vmatmul.mubr.msk.f32.vlgmr.msra.gmra.mrb[2].mxu0 %vm129_vm0, %v579_v19 }
 0x25d   :  { %v723_v20 = vpop.f32.mrb[2].mxu1 }
 0x25e   :  { %v830_v21 = vpop.f32.mrb[3].mxu1 }
 0x25f   :  { %v648_v22 = vpop.f32.mrb[2].mxu0 }
 0x260   :  { %v724_v24 = vadd.f32 %v723_v20, %v648_v22  ;;  %v823_v25 = vpop.f32.mrb[3].mxu0 }
 0x262   :  { %v734_v26 = vadd.f32 %v766_v23, %v724_v24 }
 0x264   :  { %735 = vst [vmem:[#allocation13] sm:$0x3] %v734_v26 }
 0x265   :  { %1028 = shalt.err (!%p1025_p10)
}
 0x266   :  { %s1029_s1 = scalar_lea.hbm %s1318_s11, 32 }
 0x267   :  { %p1030_p11 = scmp.ne.s32.totalorder %s1318_s11, %s1029_s1  ;;  %p1033_p12 = scmp.lt.u32.totalorder %s1029_s1, %s1318_s11 }
 0x269   :  { %p1035_p13 = pnand %p1033_p12, %p1030_p11 }
 0x26b   :  { %1038 = shalt.err (!%p1035_p13)
}
 0x26c   :  { %745 = dma.vmem_to_hbm [thread:$0]  %s743_s22, 32, %s1318_s11, [#allocation4]  }
 0x26d   :  { %1047 = dma.done.wait [#allocation4], 32  }
 0x26e   :  { %1048 = vsyncadd [#allocation4], 4294967264 }
 0x26f   :  { %749 = vsyncpa [#allocation3], 1 }
 0x270   :  { %750 = vsyncpa [#allocation6], 1 }
 0x271   :  { %751 = vsyncpa [#allocation9], 1 }
 0x272   :  { %752 = vsyncpa [#allocation12], 1 }
 0x273   :  { %753 = vsyncpa [#allocation4], 1 }

// kernel: tpu_custom_call.1
= control target key start
LH: loop header
LB: loop body
LE: loop exit
PB: predicated region body
PF: predicated region fallthrough
CT: control target
= control target key end

     0   :  { %16 = vsyncpa [#allocation3], 0  ;;  %s1307_s0 = inlined_call_operand.hbm [shape: f32[2,8,16], index: 0, kind: input, shape index: {}]   ;;  %s1308_s1 = inlined_call_operand.hbm [shape: f32[2,8,16], index: 1, kind: input, shape index: {}]   ;;  %s1309_s2 = inlined_call_operand.hbm [shape: f32[16,16], index: 2, kind: input, shape index: {}]   ;;  %s1310_s3 = inlined_call_operand.hbm [shape: f32[16,16], index: 3, kind: input, shape index: {}]   ;;  %s1311_s4 = inlined_call_operand.hbm [shape: f32[16,16], index: 4, kind: input, shape index: {}]   ;;  %s1312_s5 = inlined_call_operand.vmem [shape: f32[16,16], index: 5, kind: input, shape index: {}]   ;;  %s1313_s6 = inlined_call_operand.vmem [shape: f32[1,16], index: 6, kind: input, shape index: {}]   ;;  %s1314_s7 = inlined_call_operand.vmem [shape: f32[1,16], index: 7, kind: input, shape index: {}]   ;;  %s1315_s8 = inlined_call_operand.hbm [shape: f32[16,128], index: 8, kind: input, shape index: {}]   ;;  %s1316_s9 = inlined_call_operand.vmem [shape: f32[16,128], index: 9, kind: input, shape index: {}]   ;;  %s1317_s10 = inlined_call_operand.vmem [shape: f32[1,128], index: 10, kind: input, shape index: {}]   ;;  %s1318_s11 = inlined_call_operand.hbm [shape: f32[2,128], index: 11, kind: output, shape index: {}]  }
   0x1   :  { %17 = vsyncpa [#allocation6], 0 }
   0x2   :  { %18 = vsyncpa [#allocation9], 0 }
   0x3   :  { %19 = vsyncpa [#allocation12], 0 }
   0x4   :  { %20 = vsyncpa [#allocation4], 0  ;;  %s1049_s17 = smov [#allocation5]   ;;  %s1050_s19 = smov [#allocation8]  }
   0x5   :  { %s38_s18 = sshll.u32 %s1049_s17, 4  ;;  %s62_s20 = sshll.u32 %s1050_s19, 4  ;;  %s39_s18 = int_to_ptr.vmem [resolvable:$true] %s38_s18  ;;  %s1121_s20 = int_to_ptr.vmem [resolvable:$true] %s62_s20 }
   0x6   :  { %s885_s23 = scalar_lea.hbm %s1308_s1, 256 }
   0x7   :  { %p886_p0 = scmp.ne.s32.totalorder %s1308_s1, %s885_s23  ;;  %p889_p1 = scmp.lt.u32.totalorder %s885_s23, %s1308_s1 }
   0x9   :  { %p891_p2 = pnand %p889_p1, %p886_p0 }
   0xb   :  { %894 = shalt.err (!%p891_p2)
}
   0xc   :  { %s895_s28 = scalar_lea.vmem %s39_s18, 256  ;;  %p900_p4 = scmp.lt.s32.totalorder %s39_s18, %s39_s18 }
   0xd   :  { %p896_p3 = scmp.ne.s32.totalorder %s39_s18, %s895_s28  ;;  %p901_p5 = scmp.lt.s32.totalorder %s895_s28, %s895_s28 }
   0xf   :  { %p902_p6 = por %p901_p5, %p900_p4 }
  0x11   :  { %p903_p7 = pnand %p902_p6, %p896_p3 }
  0x13   :  { %906 = shalt.err (!%p903_p7)
}
  0x14   :  { %s1051_s29 = smov 128   ;;  %s1052_s30 = smov 8  }
  0x15   :  { %44 = dma.hbm_to_vmem [thread:$0]  %s1308_s1, 256, %s39_s18, [#allocation6], %s1051_s29, %s1051_s29, %s1052_s30  }
  0x16   :  { %s907_s16 = scalar_lea.hbm %s1310_s3, 256 }
  0x17   :  { %p908_p8 = scmp.ne.s32.totalorder %s1310_s3, %s907_s16  ;;  %p911_p9 = scmp.lt.u32.totalorder %s907_s16, %s1310_s3 }
  0x19   :  { %p913_p10 = pnand %p911_p9, %p908_p8 }
  0x1b   :  { %916 = shalt.err (!%p913_p10)
}
  0x1c   :  { %s917_s23 = scalar_lea.vmem %s1121_s20, 256  ;;  %p922_p12 = scmp.lt.s32.totalorder %s1121_s20, %s1121_s20 }
  0x1d   :  { %p918_p11 = scmp.ne.s32.totalorder %s1121_s20, %s917_s23  ;;  %p923_p13 = scmp.lt.s32.totalorder %s917_s23, %s917_s23 }
  0x1f   :  { %p924_p0 = por %p923_p13, %p922_p12 }
  0x21   :  { %p925_p1 = pnand %p924_p0, %p918_p11 }
  0x23   :  { %928 = shalt.err (!%p925_p1)
}
  0x24   :  { %68 = dma.hbm_to_vmem [thread:$0]  %s1310_s3, 256, %s1121_s20, [#allocation9], %s1051_s29, %s1051_s29, %s1052_s30  }
  0x25   :  { %s1053_s24 = smov [#allocation2]   ;;  %s1054_s26 = smov [#allocation7]  }
  0x26   :  { %s26_s25 = sshll.u32 %s1053_s24, 4  ;;  %s50_s27 = sshll.u32 %s1054_s26, 4  ;;  %s27_s25 = int_to_ptr.vmem [resolvable:$true] %s26_s25  ;;  %s1158_s27 = int_to_ptr.vmem [resolvable:$true] %s50_s27 }
  0x27   :  { %s929_s13 = scalar_lea.hbm %s1307_s0, 256 }
  0x28   :  { %p930_p2 = scmp.ne.s32.totalorder %s1307_s0, %s929_s13  ;;  %p933_p3 = scmp.lt.u32.totalorder %s929_s13, %s1307_s0 }
  0x2a   :  { %p935_p4 = pnand %p933_p3, %p930_p2 }
  0x2c   :  { %938 = shalt.err (!%p935_p4)
}
  0x2d   :  { %s939_s3 = scalar_lea.vmem %s27_s25, 256  ;;  %p944_p6 = scmp.lt.s32.totalorder %s27_s25, %s27_s25 }
  0x2e   :  { %p940_p5 = scmp.ne.s32.totalorder %s27_s25, %s939_s3  ;;  %p945_p7 = scmp.lt.s32.totalorder %s939_s3, %s939_s3 }
  0x30   :  { %p946_p8 = por %p945_p7, %p944_p6 }
  0x32   :  { %p947_p9 = pnand %p946_p8, %p940_p5 }
  0x34   :  { %950 = shalt.err (!%p947_p9)
}
  0x35   :  { %32 = dma.hbm_to_vmem [thread:$0]  %s1307_s0, 256, %s27_s25, [#allocation3], %s1051_s29, %s1051_s29, %s1052_s30  }
  0x36   :  { %s951_s23 = scalar_lea.hbm %s1309_s2, 256 }
  0x37   :  { %p952_p10 = scmp.ne.s32.totalorder %s1309_s2, %s951_s23  ;;  %p955_p11 = scmp.lt.u32.totalorder %s951_s23, %s1309_s2 }
  0x39   :  { %p957_p12 = pnand %p955_p11, %p952_p10 }
  0x3b   :  { %960 = shalt.err (!%p957_p12)
}
  0x3c   :  { %s961_s28 = scalar_lea.vmem %s1158_s27, 256  ;;  %p966_p0 = scmp.lt.s32.totalorder %s1158_s27, %s1158_s27 }
  0x3d   :  { %p962_p13 = scmp.ne.s32.totalorder %s1158_s27, %s961_s28  ;;  %p967_p1 = scmp.lt.s32.totalorder %s961_s28, %s961_s28 }
  0x3f   :  { %p968_p2 = por %p967_p1, %p966_p0 }
  0x41   :  { %p969_p3 = pnand %p968_p2, %p962_p13 }
  0x43   :  { %972 = shalt.err (!%p969_p3)
}
  0x44   :  { %56 = dma.hbm_to_vmem [thread:$0]  %s1309_s2, 256, %s1158_s27, [#allocation6], %s1051_s29, %s1051_s29, %s1052_s30  }
  0x45   :  { %s1055_s12 = smov [#allocation10]   ;;  %s1056_s14 = smov [#allocation11]  }
  0x46   :  { %s74_s13 = sshll.u32 %s1055_s12, 4  ;;  %s92_s15 = sshll.u32 %s1056_s14, 4  ;;  %s75_s13 = int_to_ptr.vmem [resolvable:$true] %s74_s13  ;;  %s1195_s15 = int_to_ptr.vmem [resolvable:$true] %s92_s15 }
  0x47   :  { %s973_s3 = scalar_lea.hbm %s1311_s4, 256 }
  0x48   :  { %p974_p4 = scmp.ne.s32.totalorder %s1311_s4, %s973_s3  ;;  %p977_p5 = scmp.lt.u32.totalorder %s973_s3, %s1311_s4 }
  0x4a   :  { %p979_p6 = pnand %p977_p5, %p974_p4 }
  0x4c   :  { %982 = shalt.err (!%p979_p6)
}
  0x4d   :  { %s983_s2 = scalar_lea.vmem %s75_s13, 256  ;;  %p988_p8 = scmp.lt.s32.totalorder %s75_s13, %s75_s13 }
  0x4e   :  { %p984_p7 = scmp.ne.s32.totalorder %s75_s13, %s983_s2  ;;  %p989_p9 = scmp.lt.s32.totalorder %s983_s2, %s983_s2 }
  0x50   :  { %p990_p10 = por %p989_p9, %p988_p8 }
  0x52   :  { %p991_p11 = pnand %p990_p10, %p984_p7 }
  0x54   :  { %994 = shalt.err (!%p991_p11)
}
  0x55   :  { %80 = dma.hbm_to_vmem [thread:$0]  %s1311_s4, 256, %s75_s13, [#allocation9], %s1051_s29, %s1051_s29, %s1052_s30  }
  0x56   :  { %s995_s24 = scalar_lea.hbm %s1315_s8, 256 }
  0x57   :  { %p996_p12 = scmp.ne.s32.totalorder %s1315_s8, %s995_s24  ;;  %p999_p13 = scmp.lt.u32.totalorder %s995_s24, %s1315_s8 }
  0x59   :  { %p1001_p0 = pnand %p999_p13, %p996_p12 }
  0x5b   :  { %1004 = shalt.err (!%p1001_p0)
}
  0x5c   :  { %s1005_s12 = scalar_lea.vmem %s1195_s15, 256  ;;  %p1010_p2 = scmp.lt.s32.totalorder %s1195_s15, %s1195_s15 }
  0x5d   :  { %p1006_p1 = scmp.ne.s32.totalorder %s1195_s15, %s1005_s12  ;;  %p1011_p3 = scmp.lt.s32.totalorder %s1005_s12, %s1005_s12 }
  0x5f   :  { %p1012_p4 = por %p1011_p3, %p1010_p2 }
  0x61   :  { %p1013_p5 = pnand %p1012_p4, %p1006_p1 }
  0x63   :  { %1016 = shalt.err (!%p1013_p5)
}
  0x64   :  { %98 = dma.hbm_to_vmem [thread:$0]  %s1315_s8, 256, %s1195_s15, [#allocation12], %s1051_s29, %s1051_s29, %s1052_s30  }
  0x65   :  { %1039 = dma.done.wait [#allocation3], 256  }
  0x66   :  { %1040 = vsyncadd [#allocation3], 4294967040 }
  0x67   :  { %1041 = dma.done.wait [#allocation6], 512  }
  0x68   :  { %1042 = vsyncadd [#allocation6], 4294966784 }
  0x69   :  { %1043 = dma.done.wait [#allocation9], 512  }
  0x6a   :  { %1044 = vsyncadd [#allocation9], 4294966784 }
  0x6b   :  { %1045 = dma.done.wait [#allocation12], 256  }
  0x6c   :  { %1046 = vsyncadd [#allocation12], 4294967040  ;;  %vm129_vm0 = vcmask 130048   ;;  %v127_v0 = vld [vmem:[#allocation8] sm:$0xff]  ;;  %v128_v1 = vld [vmem:[#allocation8 + $0x8] sm:$0xff]  ;;  %v1057_v19 = vmov 0.0|0.0  }
  0x6d   :  { %v303_v2 = vld [vmem:[%s1312_s5] sm:$0xff]  ;;  %v831_v3 = vpack.c.bf16 %v128_v1, %v127_v0  ;;  %v304_v4 = vld [vmem:[%s1312_s5 + $0x8] sm:$0xff]  ;;  %v1238_v5 = vld [vmem:[#allocation5] sm:$0xff]  ;;  %vm1058_vm1 = vmmov 0   ;;  %v1059_v23 = vmov 0.0   ;;  %vm578_vm2 = vcmask 1041409  }
  0x6e   :  { %v839_v6 = vpack.c.bf16 %v304_v4, %v303_v2  ;;  %793 = vmatprep.mubr.msk.f32.mxu0 %vm129_vm0, %v1238_v5  ;;  %807 = vmatprep.mubr.msk.f32.mxu1 %vm129_vm0, %v1238_v5  ;;  %v125_v7 = vld [vmem:[#allocation7] sm:$0xff]  ;;  %v126_v8 = vld [vmem:[#allocation7 + $0x8] sm:$0xff]  ;;  %v1244_v12 = vld [vmem:[#allocation5 + $0x8] sm:$0xff] }
  0x6f   :  { %v301_v9 = vld [vmem:[#allocation10] sm:$0xff]  ;;  %832 = vmatprep.subr.bf16.mxu0 %v831_v3  ;;  %v835_v10 = vpack.c.bf16 %v126_v8, %v125_v7  ;;  %v302_v11 = vld [vmem:[#allocation10 + $0x8] sm:$0xff]  ;;  %v572_v18 = vld [vmem:[#allocation11] sm:$0xff] }
  0x70   :  { %840 = vmatprep.subr.bf16.mxu1 %v839_v6  ;;  %834 = vmatpush3.bf16.msra.mxu0 %v831_v3  ;;  %v843_v13 = vpack.c.bf16 %v302_v11, %v301_v9  ;;  %v1246_v14 = vld [vmem:[#allocation2] sm:$0xff]  ;;  %v1256_v15 = vld [vmem:[#allocation2 + $0x8] sm:$0xff]  ;;  %v573_v21 = vld [vmem:[#allocation11 + $0x8] sm:$0xff] }
  0x71   :  { %842 = vmatpush3.bf16.msra.mxu1 %v839_v6  ;;  %836 = vmatprep.subr.bf16.mxu0 %v835_v10  ;;  %v574_v16 = vld [vmem:[%s1316_s9] sm:$0xff]  ;;  %v575_v17 = vld [vmem:[%s1316_s9 + $0x8] sm:$0xff]  ;;  %v851_v22 = vpack.c.bf16 %v573_v21, %v572_v18  ;;  %s1060_s9 = smov [#allocation13]  }
  0x72   :  { %844 = vmatprep.subr.bf16.mxu1 %v843_v13  ;;  %v848_v20 = vpack.c.bf16 %v575_v17, %v574_v16  ;;  %v758_v24 = vld [vmem:[%s1313_s6] ss:$0 sm:$0xff]  ;;  %s742_s22 = sshll.u32 %s1060_s9, 4  ;;  %s743_s22 = int_to_ptr.vmem [resolvable:$true] %s742_s22 }
  0x73   :  { %794 = vmatmul.mubr.msk.f32.vlgmr.msra.gmra.mrb[0].mxu0 %vm129_vm0, %v1244_v12  ;;  %v763_v25 = vld [vmem:[%s1314_s7] ss:$0 sm:$0xff]  ;;  %s1017_s2 = scalar_lea.vmem %s743_s22, 32  ;;  %p1022_p7 = scmp.lt.s32.totalorder %s743_s22, %s743_s22 }
  0x74   :  { %808 = vmatmul.mubr.msk.f32.vlgmr.msra.gmra.mrb[0].mxu1 %vm129_vm0, %v1244_v12  ;;  %838 = vmatpush3.bf16.msra.mxu0 %v835_v10  ;;  %p1018_p6 = scmp.ne.s32.totalorder %s743_s22, %s1017_s2  ;;  %p1023_p8 = scmp.lt.s32.totalorder %s1017_s2, %s1017_s2 }
  0x75   :  { %846 = vmatpush3.bf16.msra.mxu1 %v843_v13  ;;  %800 = vmatprep.mubr.msk.f32.mxu0 %vm129_vm0, %v1246_v14 }
  0x76   :  { %814 = vmatprep.mubr.msk.f32.mxu1 %vm129_vm0, %v1246_v14  ;;  %847 = vmatprep.subr.bf16.mxu0 %v1057_v19  ;;  %p1024_p9 = por %p1023_p8, %p1022_p7 }
  0x77   :  { %850 = vmatprep.subr.bf16.mxu1 %v1057_v19 }
  0x78   :  { %p1025_p10 = pnand %p1024_p9, %p1018_p6 }
  0x7b   :  { %801 = vmatmul.mubr.msk.f32.vlgmr.msra.gmra.mrb[0].mxu0 %vm129_vm0, %v1256_v15 }
  0x7c   :  { %815 = vmatmul.mubr.msk.f32.vlgmr.msra.gmra.mrb[0].mxu1 %vm129_vm0, %v1256_v15  ;;  %821 = vmatprep.mubr.msk.f32.mxu0 %vm1058_vm1, %v1059_v23 }
  0x7d   :  { %828 = vmatprep.mubr.msk.f32.mxu1 %vm1058_vm1, %v1059_v23  ;;  %849 = vmatpush3.bf16.msra.mxu0 %v848_v20 }
  0x7e   :  { %852 = vmatpush3.bf16.msra.mxu1 %v851_v22 }
 0x14e   :  { %v802_v26 = vpop.f32.mrb[0].mxu0 }
 0x14f   :  { %v300_v27 = vadd.f32 %v802_v26, %v758_v24  ;;  %v816_v28 = vpop.f32.mrb[0].mxu1  ;;  %v283_v29 = vpop.f32.mrb[1].mxu0 }
 0x150   :  { %v463_v30 = vadd.f32 %v816_v28, %v763_v25  ;;  %v299_v31 = vadd.f32 %v758_v24, %v283_v29  ;;  %v446_v32 = vpop.f32.mrb[1].mxu1 }
 0x151   :  { %v471_v33 = vsel %vm129_vm0, %v300_v27, -inf  ;;  %v462_v34 = vadd.f32 %v763_v25, %v446_v32 }
 0x152   :  { %v472_v35 = vrot.slane %v471_v33, 4  ;;  %v491_v36 = vsel %vm129_vm0, %v463_v30, -inf  ;;  %v464_v37 = vsel %vm129_vm0, %v299_v31, -inf }
 0x153   :  { %v492_v38 = vrot.slane %v491_v36, 4  ;;  %v465_v39 = vrot.slane %v464_v37, 4  ;;  %v484_v40 = vsel %vm129_vm0, %v462_v34, -inf }
 0x154   :  { %v473_v41 = vmax.f32 %v471_v33, %v472_v35  ;;  %v485_v42 = vrot.slane %v484_v40, 4 }
 0x155   :  { %v493_v43 = vmax.f32 %v491_v36, %v492_v38  ;;  %v466_v44 = vmax.f32 %v464_v37, %v465_v39 }
 0x156   :  { %v474_v45 = vrot.slane %v473_v41, 2  ;;  %v486_v46 = vmax.f32 %v484_v40, %v485_v42 }
 0x157   :  { %v494_v47 = vrot.slane %v493_v43, 2  ;;  %v467_v48 = vrot.slane %v466_v44, 2 }
 0x158   :  { %v475_v49 = vmax.f32 %v473_v41, %v474_v45  ;;  %v487_v50 = vrot.slane %v486_v46, 2 }
 0x159   :  { %v495_v51 = vmax.f32 %v493_v43, %v494_v47  ;;  %v468_v52 = vmax.f32 %v466_v44, %v467_v48 }
 0x15a   :  { %v476_v53 = vrot.slane %v475_v49, 1  ;;  %v488_v54 = vmax.f32 %v486_v46, %v487_v50 }
 0x15b   :  { %v496_v55 = vrot.slane %v495_v51, 1  ;;  %v469_v56 = vrot.slane %v468_v52, 1 }
 0x15c   :  { %v477_v57 = vmax.f32 %v475_v49, %v476_v53  ;;  %v489_v58 = vrot.slane %v488_v54, 1 }
 0x15d   :  { %v497_v59 = vmax.f32 %v495_v51, %v496_v55  ;;  %v470_v60 = vmax.f32 %v468_v52, %v469_v56 }
 0x15e   :  { %v479_v61 = vsub.f32 %v300_v27, %v477_v57  ;;  %v490_v62 = vmax.f32 %v488_v54, %v489_v58 }
 0x15f   :  { %v499_v63 = vsub.f32 %v463_v30, %v497_v59  ;;  %v478_v0 = vsub.f32 %v299_v31, %v470_v60 }
 0x160   :  { %v482_v1 = vmul.f32 1.442695, %v479_v61  ;;  %v498_v2 = vsub.f32 %v462_v34, %v490_v62 }
 0x161   :  { %v502_v3 = vmul.f32 1.442695, %v499_v63  ;;  %v480_v4 = vmul.f32 1.442695, %v478_v0 }
 0x162   :  { %869 = vpow2.f32 %v482_v1  ;;  %v500_v6 = vmul.f32 1.442695, %v498_v2 }
 0x163   :  { %871 = vpow2.f32 %v502_v3 }
 0x164   :  { %873 = vpow2.f32 %v480_v4 }
 0x165   :  { %875 = vpow2.f32 %v500_v6 }
 0x16c   :  { %v870_v7 = vpop.eup %869 }
 0x16d   :  { %v872_v8 = vpop.eup %871  ;;  %v511_v9 = vsel %vm129_vm0, %v870_v7, 0.0  ;;  %v537_v10 = vmul.f32 %v870_v7, %v1256_v15 }
 0x16e   :  { %v874_v11 = vpop.eup %873  ;;  %v512_v13 = vrot.slane %v511_v9, 4  ;;  %v527_v16 = vsel %vm129_vm0, %v872_v8, 0.0  ;;  %v555_v17 = vmul.f32 %v872_v8, %v1244_v12 }
 0x16f   :  { %v876_v18 = vpop.eup %875  ;;  %v545_v19 = vsel %vm129_vm0, %v537_v10, -inf  ;;  %v528_v20 = vrot.slane %v527_v16, 4  ;;  %v504_v21 = vsel %vm129_vm0, %v874_v11, 0.0  ;;  %v536_v22 = vmul.f32 %v874_v11, %v1246_v14 }
 0x170   :  { %v513_v23 = vadd.f32 %v512_v13, %v511_v9  ;;  %v546_v24 = vrot.slane %v545_v19, 4  ;;  %v563_v25 = vsel %vm129_vm0, %v555_v17, -inf  ;;  %v505_v26 = vrot.slane %v504_v21, 4 }
 0x171   :  { %v529_v15 = vadd.f32 %v528_v20, %v527_v16  ;;  %v564_v27 = vrot.slane %v563_v25, 4  ;;  %v538_v28 = vsel %vm129_vm0, %v536_v22, -inf  ;;  %v520_v29 = vsel %vm129_vm0, %v876_v18, 0.0 }
 0x172   :  { %v514_v12 = vrot.slane %v513_v23, 2  ;;  %v506_v30 = vadd.f32 %v505_v26, %v504_v21  ;;  %v539_v31 = vrot.slane %v538_v28, 4  ;;  %v521_v32 = vrot.slane %v520_v29, 4 }
 0x173   :  { %v530_v33 = vrot.slane %v529_v15, 2  ;;  %v554_v34 = vmul.f32 %v876_v18, %v1238_v5  ;;  %v547_v35 = vmax.f32 %v545_v19, %v546_v24  ;;  %v565_v40 = vmax.f32 %v563_v25, %v564_v27 }
 0x174   :  { %v515_v14 = vadd.f32 %v514_v12, %v513_v23  ;;  %v507_v36 = vrot.slane %v506_v30, 2  ;;  %v522_v37 = vadd.f32 %v521_v32, %v520_v29  ;;  %v540_v41 = vmax.f32 %v538_v28, %v539_v31  ;;  %v766_v23 = vld [vmem:[%s1317_s10] ss:$0 sm:$0xff] }
 0x175   :  { %v531_v38 = vadd.f32 %v530_v33, %v529_v15  ;;  %v556_v39 = vsel %vm129_vm0, %v554_v34, -inf  ;;  %v548_v47 = vrot.slane %v547_v35, 2  ;;  %v566_v52 = vrot.slane %v565_v40, 2 }
 0x176   :  { %v516_v42 = vrot.slane %v515_v14, 1  ;;  %v508_v43 = vadd.f32 %v507_v36, %v506_v30  ;;  %v523_v44 = vrot.slane %v522_v37, 2  ;;  %v557_v45 = vrot.slane %v556_v39, 4 }
 0x177   :  { %v532_v46 = vrot.slane %v531_v38, 1  ;;  %v541_v53 = vrot.slane %v540_v41, 2  ;;  %v549_v57 = vmax.f32 %v547_v35, %v548_v47  ;;  %v567_v59 = vmax.f32 %v565_v40, %v566_v52 }
 0x178   :  { %v517_v48 = vadd.f32 %v516_v42, %v515_v14  ;;  %v509_v49 = vrot.slane %v508_v43, 1  ;;  %v524_v50 = vadd.f32 %v523_v44, %v522_v37  ;;  %v558_v51 = vmax.f32 %v556_v39, %v557_v45 }
 0x179   :  { %v533_v5 = vadd.f32 %v532_v46, %v531_v38  ;;  %v542_v60 = vmax.f32 %v540_v41, %v541_v53  ;;  %v550_v62 = vrot.slane %v549_v57, 1  ;;  %v568_v63 = vrot.slane %v567_v59, 1 }
 0x17a   :  { %877 = vrcp.f32 %v517_v48  ;;  %v510_v54 = vadd.f32 %v509_v49, %v508_v43  ;;  %v525_v55 = vrot.slane %v524_v50, 1  ;;  %v559_v56 = vrot.slane %v558_v51, 2 }
 0x17b   :  { %879 = vrcp.f32 %v533_v5  ;;  %v543_v0 = vrot.slane %v542_v60, 1  ;;  %v551_v2 = vmax.f32 %v549_v57, %v550_v62  ;;  %v569_v6 = vmax.f32 %v567_v59, %v568_v63 }
 0x17c   :  { %881 = vrcp.f32 %v510_v54  ;;  %v526_v58 = vadd.f32 %v525_v55, %v524_v50  ;;  %v560_v61 = vmax.f32 %v558_v51, %v559_v56 }
 0x17d   :  { %v544_v7 = vmax.f32 %v542_v60, %v543_v0 }
 0x17e   :  { %883 = vrcp.f32 %v526_v58  ;;  %v561_v1 = vrot.slane %v560_v61, 1 }
 0x180   :  { %v562_v10 = vmax.f32 %v560_v61, %v561_v1 }
 0x184   :  { %v878_v3 = vpop.eup %877 }
 0x185   :  { %v880_v4 = vpop.eup %879  ;;  %v553_v8 = vmul.f32 %v878_v3, %v551_v2 }
 0x186   :  { %v882_v9 = vpop.eup %881  ;;  %v571_v11 = vmul.f32 %v880_v4, %v569_v6 }
 0x187   :  { %v552_v13 = vmul.f32 %v882_v9, %v544_v7 }
 0x188   :  { %v884_v16 = vpop.eup %883 }
 0x189   :  { %v570_v17 = vmul.f32 %v884_v16, %v562_v10  ;;  %v654_v18 = vsel %vm578_vm2, %v553_v8, %v552_v13 }
 0x18a   :  { %829 = vmatmul.mubr.msk.f32.vlgmr.msra.gmra.mrb[2].mxu1 %vm129_vm0, %v654_v18 }
 0x18b   :  { %v579_v19 = vsel %vm578_vm2, %v571_v11, %v570_v17 }
 0x18c   :  { %822 = vmatmul.mubr.msk.f32.vlgmr.msra.gmra.mrb[2].mxu0 %vm129_vm0, %v579_v19 }
 0x25d   :  { %v723_v20 = vpop.f32.mrb[2].mxu1 }
 0x25e   :  { %v830_v21 = vpop.f32.mrb[3].mxu1 }
 0x25f   :  { %v648_v22 = vpop.f32.mrb[2].mxu0 }
 0x260   :  { %v724_v24 = vadd.f32 %v723_v20, %v648_v22  ;;  %v823_v25 = vpop.f32.mrb[3].mxu0 }
 0x262   :  { %v734_v26 = vadd.f32 %v766_v23, %v724_v24 }
 0x264   :  { %735 = vst [vmem:[#allocation13] sm:$0x3] %v734_v26 }
 0x265   :  { %1028 = shalt.err (!%p1025_p10)
}
 0x266   :  { %s1029_s1 = scalar_lea.hbm %s1318_s11, 32 }
 0x267   :  { %p1030_p11 = scmp.ne.s32.totalorder %s1318_s11, %s1029_s1  ;;  %p1033_p12 = scmp.lt.u32.totalorder %s1029_s1, %s1318_s11 }
 0x269   :  { %p1035_p13 = pnand %p1033_p12, %p1030_p11 }
 0x26b   :  { %1038 = shalt.err (!%p1035_p13)
}
 0x26c   :  { %745 = dma.vmem_to_hbm [thread:$0]  %s743_s22, 32, %s1318_s11, [#allocation4]  }
 0x26d   :  { %1047 = dma.done.wait [#allocation4], 32  }
 0x26e   :  { %1048 = vsyncadd [#allocation4], 4294967264 }
 0x26f   :  { %749 = vsyncpa [#allocation3], 1 }
 0x270   :  { %750 = vsyncpa [#allocation6], 1 }
 0x271   :  { %751 = vsyncpa [#allocation9], 1 }
 0x272   :  { %752 = vsyncpa [#allocation12], 1 }
 0x273   :  { %753 = vsyncpa [#allocation4], 1 }

</bundles_post_ra>
